<compile_context>
chip_gen: v6e
topology: v6e:2x2x1
jax: 0.10.0
libtpu: 0.0.40
codegen_flags: <defaults>
</compile_context>

<pallas_src>
import functools
import math

import jax
import jax.numpy as jnp
from jax.experimental import pallas as pl
from jax.experimental.pallas import tpu as pltpu


# ----------------------------- kernel ---------------------------------------
def _gen_kernel(x_ref, w1_ref, b1_ref, w2_ref, b2_ref,
                w3_ref, b3_ref, w4_ref, b4_ref, o_ref, *, relu_bf16):
    cdt = w1_ref.dtype                       # compute dtype (bf16)
    x = x_ref[...].astype(cdt)               # f32 -> bf16 cast done in-kernel

    def linear_relu(h, w_ref, b_ref):
        a = jnp.dot(h, w_ref[...], preferred_element_type=jnp.float32) + b_ref[...]
        if relu_bf16:
            # v6e/v7x: ReLU on bf16 vregs (2048 elems/vreg -> half the max ops).
            return jnp.maximum(a.astype(cdt), 0)
        # v5e: no bf16 VALU -> keep ReLU in f32, cast only for the next MXU pass.
        return jnp.maximum(a, 0.0).astype(cdt)

    h = linear_relu(x, w1_ref, b1_ref)
    h = linear_relu(h, w2_ref, b2_ref)
    h = linear_relu(h, w3_ref, b3_ref)
    out = jnp.dot(h, w4_ref[...], preferred_element_type=jnp.float32) + b4_ref[...]
    o_ref[...] = out.astype(o_ref.dtype)


# ----------------------------- wrapper ---------------------------------------
def _round_up(x, m):
    return (x + m - 1) // m * m


def _auto_relu_bf16():
    # bf16 VALU exists on v6e / v7x; on v5e bf16 elementwise decomposes (slower).
    try:
        kind = jax.devices()[0].device_kind.lower()
    except Exception:
        return False
    return ("v6" in kind) or ("v7" in kind)


def prepare_params(params, compute_dtype=jnp.bfloat16):
    """One-time weight/bias cast (hoist out of the per-call path)."""
    prep = {}
    for n in range(1, 5):
        prep[f"w{n}"] = jnp.asarray(params[f"w{n}"], compute_dtype)   # (in, out)
        prep[f"b{n}"] = jnp.asarray(params[f"b{n}"], jnp.float32)     # (1, out)
    return prep


def generator_forward(x, prepared, *, batch_tile=512, out_dtype=jnp.float32,
                      relu_bf16=None):
    """x: (B, 100) f32. prepared: output of prepare_params(). Returns (B, 784)."""
    B, d_in = x.shape
    assert d_in == 100
    if relu_bf16 is None:
        relu_bf16 = _auto_relu_bf16()

    # ---- batch tiling: big tiles, but always >= 2 evenly-sized grid steps
    # (when B allows) so both v7x TensorCores are used.
    if B > 8:
        n_tiles = max(2, pl.cdiv(B, batch_tile))
    else:
        n_tiles = 1
    bt = _round_up(pl.cdiv(B, n_tiles), 8)        # sublane-aligned tile
    b_pad = n_tiles * bt

    x_in = x if b_pad == B else jnp.pad(x, ((0, b_pad - B), (0, 0)))

    w1, b1 = prepared["w1"], prepared["b1"]
    w2, b2 = prepared["w2"], prepared["b2"]
    w3, b3 = prepared["w3"], prepared["b3"]
    w4, b4 = prepared["w4"], prepared["b4"]
    d_out = w4.shape[1]

    def resident(arr):
        # Full-array block, constant index -> stays in VMEM across the grid.
        # Buffered(1): never re-fetched, so a 2nd pipeline buffer is wasted VMEM.
        return pl.BlockSpec(arr.shape, lambda i: (0, 0),
                            pipeline_mode=pl.Buffered(1))

    kernel = functools.partial(_gen_kernel, relu_bf16=relu_bf16)

    out = pl.pallas_call(
        kernel,
        out_shape=jax.ShapeDtypeStruct((b_pad, d_out), out_dtype),
        grid_spec=pltpu.PrefetchScalarGridSpec(
            num_scalar_prefetch=0,
            grid=(n_tiles,),
            in_specs=[
                pl.BlockSpec((bt, d_in), lambda i: (i, 0)),   # x tile (f32)
                resident(w1), resident(b1),
                resident(w2), resident(b2),
                resident(w3), resident(b3),
                resident(w4), resident(b4),
            ],
            out_specs=pl.BlockSpec((bt, d_out), lambda i: (i, 0)),
        ),
        compiler_params=pltpu.CompilerParams(
            dimension_semantics=("parallel",),
            vmem_limit_bytes=32 * 1024 * 1024),
    )(x_in, w1, b1, w2, b2, w3, b3, w4, b4)

    return out if b_pad == B else out[:B]


# ----------------------------- init (matches PyTorch spec) -------------------
def _kaiming_uniform(key, fan_in, fan_out):
    # weights_init applies torch.nn.init.kaiming_uniform_(weight) with defaults:
    # a=0, mode='fan_in', nonlinearity='leaky_relu' -> bound = sqrt(6 / fan_in).
    # Stored transposed as (in, out) so the kernel computes x @ W + b.
    bound = math.sqrt(6.0 / fan_in)
    return jax.random.uniform(key, (fan_in, fan_out), jnp.float32, -bound, bound)


def _bias_default(key, fan_in, fan_out):
    # Bias is untouched by weights_init -> nn.Linear default:
    # U(-1/sqrt(fan_in), 1/sqrt(fan_in)).
    bound = 1.0 / math.sqrt(fan_in)
    return jax.random.uniform(key, (1, fan_out), jnp.float32, -bound, bound)


def init_params(key):
    dims = [(100, 256), (256, 512), (512, 512), (512, 784)]
    params = {}
    keys = jax.random.split(key, 2 * len(dims))
    for n, (fi, fo) in enumerate(dims):
        params[f"w{n + 1}"] = _kaiming_uniform(keys[2 * n], fi, fo)
        params[f"b{n + 1}"] = _bias_default(keys[2 * n + 1], fi, fo)
    return params


def _reference_forward(x, params, compute_dtype=jnp.bfloat16):
    # Plain-JAX reference with the same bf16 casts / f32 accumulation.
    h = x.astype(compute_dtype)
    for n in range(1, 5):
        w = params[f"w{n}"].astype(compute_dtype)
        b = params[f"b{n}"].astype(jnp.float32)
        a = jnp.dot(h, w, preferred_element_type=jnp.float32) + b
        h = jnp.maximum(a, 0.0).astype(compute_dtype) if n < 4 else a
    return h


if __name__ == "__main__":
    key = jax.random.PRNGKey(0)
    k_params, k_x = jax.random.split(key)
    params = init_params(k_params)
    prepared = prepare_params(params)          # one-time weight cast

    B = 64                                     # small test batch -> 2 grid steps of 32
    x = jax.random.normal(k_x, (B, 100), jnp.float32)

    out = generator_forward(x, prepared)       # out_dtype=f32 (bf16 available as option)
    out = jax.block_until_ready(out)

    ref = _reference_forward(x, params)
    assert out.shape == (B, 784)
    assert jnp.allclose(out, ref.astype(out.dtype), atol=2e-2, rtol=2e-2)

    print("KERNEL_OK")
</pallas_src>

<mosaic_0001>
module attributes {stable_mosaic.version = 11 : i64} {
  func.func @_gen_kernel(%arg0: i32, %arg1: memref<32x100xf32, #tpu.memory_space<vmem>>, %arg2: memref<100x256xbf16, #tpu.memory_space<vmem>>, %arg3: memref<1x256xf32, #tpu.memory_space<vmem>>, %arg4: memref<256x512xbf16, #tpu.memory_space<vmem>>, %arg5: memref<1x512xf32, #tpu.memory_space<vmem>>, %arg6: memref<512x512xbf16, #tpu.memory_space<vmem>>, %arg7: memref<1x512xf32, #tpu.memory_space<vmem>>, %arg8: memref<512x784xbf16, #tpu.memory_space<vmem>>, %arg9: memref<1x784xf32, #tpu.memory_space<vmem>>, %arg10: memref<32x784xf32, #tpu.memory_space<vmem>>) attributes {dimension_semantics = [#tpu.dimension_semantics<parallel>], iteration_bounds = array<i64: 2>, scalar_prefetch = 0 : i64, scratch_operands = 0 : i64, tpu.core_type = #tpu.core_type<tc>, window_params = [{transform_indices = @transform_0, window_bounds = array<i64: 32, 100>}, {pipeline_mode = #tpu.pipeline_mode<synchronous>, transform_indices = @transform_1, window_bounds = array<i64: 100, 256>}, {pipeline_mode = #tpu.pipeline_mode<synchronous>, transform_indices = @transform_2, window_bounds = array<i64: 1, 256>}, {pipeline_mode = #tpu.pipeline_mode<synchronous>, transform_indices = @transform_3, window_bounds = array<i64: 256, 512>}, {pipeline_mode = #tpu.pipeline_mode<synchronous>, transform_indices = @transform_4, window_bounds = array<i64: 1, 512>}, {pipeline_mode = #tpu.pipeline_mode<synchronous>, transform_indices = @transform_5, window_bounds = array<i64: 512, 512>}, {pipeline_mode = #tpu.pipeline_mode<synchronous>, transform_indices = @transform_6, window_bounds = array<i64: 1, 512>}, {pipeline_mode = #tpu.pipeline_mode<synchronous>, transform_indices = @transform_7, window_bounds = array<i64: 512, 784>}, {pipeline_mode = #tpu.pipeline_mode<synchronous>, transform_indices = @transform_8, window_bounds = array<i64: 1, 784>}, {transform_indices = @transform_9, window_bounds = array<i64: 32, 784>}]} {
    %c0 = arith.constant 0 : index
    %c0_0 = arith.constant 0 : index
    %0 = vector.load %arg1[%c0, %c0_0] : memref<32x100xf32, #tpu.memory_space<vmem>>, vector<32x100xf32>
    %1 = arith.truncf %0 : vector<32x100xf32> to vector<32x100xbf16>
    %c0_1 = arith.constant 0 : index
    %c0_2 = arith.constant 0 : index
    %2 = vector.load %arg2[%c0_1, %c0_2] : memref<100x256xbf16, #tpu.memory_space<vmem>>, vector<100x256xbf16>
    %cst = arith.constant dense<0.000000e+00> : vector<32x256xf32>
    %3 = tpu.matmul %1, %2, %cst {dimension_numbers = #tpu.dot_dimension_numbers<[1], [0], [0], [1], [0, 0, 1, 1], [], []>} : vector<32x100xbf16>, vector<100x256xbf16>, vector<32x256xf32> -> vector<32x256xf32>
    %c0_3 = arith.constant 0 : index
    %c0_4 = arith.constant 0 : index
    %4 = vector.load %arg3[%c0_3, %c0_4] : memref<1x256xf32, #tpu.memory_space<vmem>>, vector<1x256xf32>
    %5 = vector.broadcast %4 : vector<1x256xf32> to vector<32x256xf32>
    %6 = arith.addf %3, %5 : vector<32x256xf32>
    %cst_5 = arith.constant 0.000000e+00 : f32
    %7 = vector.broadcast %cst_5 : f32 to vector<32x256xf32>
    %8 = arith.maximumf %6, %7 : vector<32x256xf32>
    %9 = arith.truncf %8 : vector<32x256xf32> to vector<32x256xbf16>
    %c0_6 = arith.constant 0 : index
    %c0_7 = arith.constant 0 : index
    %10 = vector.load %arg4[%c0_6, %c0_7] : memref<256x512xbf16, #tpu.memory_space<vmem>>, vector<256x512xbf16>
    %cst_8 = arith.constant dense<0.000000e+00> : vector<32x512xf32>
    %11 = tpu.matmul %9, %10, %cst_8 {dimension_numbers = #tpu.dot_dimension_numbers<[1], [0], [0], [1], [0, 0, 1, 1], [], []>} : vector<32x256xbf16>, vector<256x512xbf16>, vector<32x512xf32> -> vector<32x512xf32>
    %c0_9 = arith.constant 0 : index
    %c0_10 = arith.constant 0 : index
    %12 = vector.load %arg5[%c0_9, %c0_10] : memref<1x512xf32, #tpu.memory_space<vmem>>, vector<1x512xf32>
    %13 = vector.broadcast %12 : vector<1x512xf32> to vector<32x512xf32>
    %14 = arith.addf %11, %13 : vector<32x512xf32>
    %cst_11 = arith.constant 0.000000e+00 : f32
    %15 = vector.broadcast %cst_11 : f32 to vector<32x512xf32>
    %16 = arith.maximumf %14, %15 : vector<32x512xf32>
    %17 = arith.truncf %16 : vector<32x512xf32> to vector<32x512xbf16>
    %c0_12 = arith.constant 0 : index
    %c0_13 = arith.constant 0 : index
    %18 = vector.load %arg6[%c0_12, %c0_13] : memref<512x512xbf16, #tpu.memory_space<vmem>>, vector<512x512xbf16>
    %cst_14 = arith.constant dense<0.000000e+00> : vector<32x512xf32>
    %19 = tpu.matmul %17, %18, %cst_14 {dimension_numbers = #tpu.dot_dimension_numbers<[1], [0], [0], [1], [0, 0, 1, 1], [], []>} : vector<32x512xbf16>, vector<512x512xbf16>, vector<32x512xf32> -> vector<32x512xf32>
    %c0_15 = arith.constant 0 : index
    %c0_16 = arith.constant 0 : index
    %20 = vector.load %arg7[%c0_15, %c0_16] : memref<1x512xf32, #tpu.memory_space<vmem>>, vector<1x512xf32>
    %21 = vector.broadcast %20 : vector<1x512xf32> to vector<32x512xf32>
    %22 = arith.addf %19, %21 : vector<32x512xf32>
    %cst_17 = arith.constant 0.000000e+00 : f32
    %23 = vector.broadcast %cst_17 : f32 to vector<32x512xf32>
    %24 = arith.maximumf %22, %23 : vector<32x512xf32>
    %25 = arith.truncf %24 : vector<32x512xf32> to vector<32x512xbf16>
    %c0_18 = arith.constant 0 : index
    %c0_19 = arith.constant 0 : index
    %26 = vector.load %arg8[%c0_18, %c0_19] : memref<512x784xbf16, #tpu.memory_space<vmem>>, vector<512x784xbf16>
    %cst_20 = arith.constant dense<0.000000e+00> : vector<32x784xf32>
    %27 = tpu.matmul %25, %26, %cst_20 {dimension_numbers = #tpu.dot_dimension_numbers<[1], [0], [0], [1], [0, 0, 1, 1], [], []>} : vector<32x512xbf16>, vector<512x784xbf16>, vector<32x784xf32> -> vector<32x784xf32>
    %c0_21 = arith.constant 0 : index
    %c0_22 = arith.constant 0 : index
    %28 = vector.load %arg9[%c0_21, %c0_22] : memref<1x784xf32, #tpu.memory_space<vmem>>, vector<1x784xf32>
    %29 = vector.broadcast %28 : vector<1x784xf32> to vector<32x784xf32>
    %30 = arith.addf %27, %29 : vector<32x784xf32>
    %c0_23 = arith.constant 0 : index
    %c0_24 = arith.constant 0 : index
    %31 = vector.load %arg10[%c0_23, %c0_24] : memref<32x784xf32, #tpu.memory_space<vmem>>, vector<32x784xf32>
    tpu.vector_store %arg10[%c0_23, %c0_24], %30 {strides = array<i32>} : memref<32x784xf32, #tpu.memory_space<vmem>>, vector<32x784xf32>,
    return
  }
  func.func @transform_0(%arg0: i32) -> (i32, i32) {
    %c0_i32 = arith.constant 0 : i32
    %c0_i32_0 = arith.constant 0 : i32
    return %arg0, %c0_i32 : i32, i32
  }
  func.func @transform_1(%arg0: i32) -> (i32, i32) {
    %c0_i32 = arith.constant 0 : i32
    %c0_i32_0 = arith.constant 0 : i32
    %c0_i32_1 = arith.constant 0 : i32
    return %c0_i32, %c0_i32_0 : i32, i32
  }
  func.func @transform_2(%arg0: i32) -> (i32, i32) {
    %c0_i32 = arith.constant 0 : i32
    %c0_i32_0 = arith.constant 0 : i32
    %c0_i32_1 = arith.constant 0 : i32
    return %c0_i32, %c0_i32_0 : i32, i32
  }
  func.func @transform_3(%arg0: i32) -> (i32, i32) {
    %c0_i32 = arith.constant 0 : i32
    %c0_i32_0 = arith.constant 0 : i32
    %c0_i32_1 = arith.constant 0 : i32
    return %c0_i32, %c0_i32_0 : i32, i32
  }
  func.func @transform_4(%arg0: i32) -> (i32, i32) {
    %c0_i32 = arith.constant 0 : i32
    %c0_i32_0 = arith.constant 0 : i32
    %c0_i32_1 = arith.constant 0 : i32
    return %c0_i32, %c0_i32_0 : i32, i32
  }
  func.func @transform_5(%arg0: i32) -> (i32, i32) {
    %c0_i32 = arith.constant 0 : i32
    %c0_i32_0 = arith.constant 0 : i32
    %c0_i32_1 = arith.constant 0 : i32
    return %c0_i32, %c0_i32_0 : i32, i32
  }
  func.func @transform_6(%arg0: i32) -> (i32, i32) {
    %c0_i32 = arith.constant 0 : i32
    %c0_i32_0 = arith.constant 0 : i32
    %c0_i32_1 = arith.constant 0 : i32
    return %c0_i32, %c0_i32_0 : i32, i32
  }
  func.func @transform_7(%arg0: i32) -> (i32, i32) {
    %c0_i32 = arith.constant 0 : i32
    %c0_i32_0 = arith.constant 0 : i32
    %c0_i32_1 = arith.constant 0 : i32
    return %c0_i32, %c0_i32_0 : i32, i32
  }
  func.func @transform_8(%arg0: i32) -> (i32, i32) {
    %c0_i32 = arith.constant 0 : i32
    %c0_i32_0 = arith.constant 0 : i32
    %c0_i32_1 = arith.constant 0 : i32
    return %c0_i32, %c0_i32_0 : i32, i32
  }
  func.func @transform_9(%arg0: i32) -> (i32, i32) {
    %c0_i32 = arith.constant 0 : i32
    %c0_i32_0 = arith.constant 0 : i32
    return %arg0, %c0_i32 : i32, i32
  }
}

</mosaic_0001>

<bundles_post_ra>
// kernel: tpu_custom_call.1
= control target key start
LH: loop header
LB: loop body
LE: loop exit
PB: predicated region body
PF: predicated region fallthrough
CT: control target
= control target key end

     0   :  { %14 = vsyncpa [#allocation3], 0  ;;  %s6919_s0 = inlined_call_operand.vmem [shape: f32[64,100], index: 0, kind: input, shape index: {}]   ;;  %s6920_s1 = inlined_call_operand.vmem [shape: bf16[100,256], index: 1, kind: input, shape index: {}]   ;;  %s6921_s2 = inlined_call_operand.vmem [shape: f32[1,256], index: 2, kind: input, shape index: {}]   ;;  %s6922_s3 = inlined_call_operand.vmem [shape: bf16[256,512], index: 3, kind: input, shape index: {}]   ;;  %s6923_s4 = inlined_call_operand.vmem [shape: f32[1,512], index: 4, kind: input, shape index: {}]   ;;  %s6924_s5 = inlined_call_operand.vmem [shape: bf16[512,512], index: 5, kind: input, shape index: {}]   ;;  %s6925_s6 = inlined_call_operand.vmem [shape: f32[1,512], index: 6, kind: input, shape index: {}]   ;;  %s6926_s7 = inlined_call_operand.vmem [shape: bf16[512,784], index: 7, kind: input, shape index: {}]   ;;  %s6927_s8 = inlined_call_operand.vmem [shape: f32[1,784], index: 8, kind: input, shape index: {}]   ;;  %s6928_s9 = inlined_call_operand.hbm [shape: f32[64,784], index: 9, kind: output, shape index: {}]  }
   0x1   :  { %16 = vsyncpa [#allocation3 + $0x1], 0  ;;  %s5343_s30 = smov 0   ;;  %s5345_s10 = smov 0  }
   0x2   :  { %s5347_s11 = smov 0   ;;  %s5349_s12 = smov 0  }
   0x3 LB: > { %s5364_s13 = sadd.s32 4294967295, %s5287_s12   ;;  %s4039_s14 = sadd.s32 4294967294, %s5287_s12   ;;  %s5287_s12 = sphi %s5349_s12, %s6936_s12   ;;  %s5283_s11 = sphi %s5347_s11, %s6935_s11   ;;  %s5279_s10 = sphi %s5345_s10, %s6934_s10   ;;  %s5275_s30 = sphi %s5343_s30, %s6933_s30  }
   0x4   : > { %s5368_s15 = sadd.s32 1, %s5287_s12   ;;  %s223_s16 = sadd.s32 1, %s5283_s11 }
   0x5   : > { %s220_s17 = ssub.s32 %s5287_s12, %s5368_s15  ;;  %p233_p0 = scmp.ne.s32.totalorder %s5283_s11, %s5279_s10 }
   0x6   : > { %p221_p1 = scmp.eq.s32.totalorder %s220_s17, 0  ;;  %p234_p2 = scmp.eq.s32.totalorder %s5364_s13, 1 }
   0x7   : > { %p239_p3 = scmp.ne.s32.totalorder %s5279_s10, %s5275_s30  ;;  %p240_p4 = scmp.eq.s32.totalorder %s4039_s14, 1 }
   0x8   : > { %s5379_s18 = scalar_select %p221_p1, %s5283_s11, %s223_s16  }
   0x9   : > { %p5381_p5 = por %p234_p2, %p233_p0  ;;  %p5385_p6 = por %p240_p4, %p239_p3 }
   0xa   : > { %6929 = sst [smem:[#allocation5_spill]] %s5379_s18  ;;  %p4042_p7 = scmp.ge.s32.totalorder %s5287_s12, 1 }
   0xb   : > { %p291_p8 = scmp.lt.s32.totalorder %s5287_s12, 3 }
   0xd   : > { %p292_p9 = pnand %p4042_p7, %p291_p8 }
   0xe   : > { %s4043_s29 = sshll.u32 (!%p292_p9), %s5364_s13, 2  ;;  %s4556_s14 = smul.u32 (!%p292_p9), 3584, %s5364_s13 }
   0xf   : > { %295 = sbr.rel (%p292_p9) target bundleno = 1113 (0x459), region = 56  ;;  %p328_p10 = scmp.lt.s32.totalorder (!%p292_p9), %s4043_s29, 7 }
  0x10   : > { %s6871_s18 = scalar_lea.hbm (!%p292_p9), %s6928_s9, %s4556_s14  ;;  %s5290_s22 = smov (!%p292_p9), [#allocation2]  }
  0x11   : > { %s5231_s24 = sshll.u32 (!%p292_p9), %s5290_s22, 4  ;;  %s5232_s24 = int_to_ptr.vmem [resolvable:$false] %s5231_s24 }
  0x14   : > { %v353_v0 = vld [vmem:[%s6920_s1 + $0x60] sm:$0x33]  ;;  %vm438_vm0 = vcmask 1041408   ;;  %v4601_v3 = vld [vmem:[%s6920_s1 + $0x54] ss:$8 sps:$4 sm:$0xff]   ;;  %v5289_v4 = vmov 0  }
  0x15   : > { %v4058_v1 = vcombine.high %v353_v0, %v353_v0  ;;  %v4057_v2 = vcombine.low %v353_v0, %v353_v0  ;;  %477 = vmatprep.mubr.bf16.mxu0 %v5289_v4  ;;  %v4603_v6 = vld [vmem:[%s6920_s1 + $0x50] ss:$8 sps:$4 sm:$0xff]   ;;  %v4604_v7 = vld [vmem:[%s6920_s1 + $0x44] ss:$8 sps:$4 sm:$0xff]   ;;  %v4606_v8 = vld [vmem:[%s6920_s1 + $0x40] ss:$8 sps:$4 sm:$0xff]  }
  0x16   : > { %v4607_v9 = vld [vmem:[%s6920_s1 + $0x34] ss:$8 sps:$4 sm:$0xff]   ;;  %v4609_v11 = vld [vmem:[%s6920_s1 + $0x30] ss:$8 sps:$4 sm:$0xff]   ;;  %v4610_v12 = vld [vmem:[%s6920_s1 + $0x24] ss:$8 sps:$4 sm:$0xff]  }
  0x17   : > { %4059 = vmatprep.subr.msk.bf16.mxu0 %vm438_vm0, %v4058_v1  ;;  %v440_v5 = vsel %vm438_vm0, %v4057_v2, 0  ;;  %v4619_v10 = vld [vmem:[%s6922_s3 + $0xe4] ss:$16 sps:$4 sm:$0xff]   ;;  %s6938_s29 = smov (!%p328_p10, %s4043_s29), 7  ;;  %v4624_v13 = vld [vmem:[%s6922_s3 + $0xe0] ss:$16 sps:$4 sm:$0xff]  }
  0x18   : > { %448 = vmatpush1.bf16.msra.mxu0 %v440_v5  ;;  %916 = vmatprep.subr.bf16.mxu1 %v4619_v10  ;;  %v4625_v14 = vld [vmem:[%s6922_s3 + $0xc4] ss:$16 sps:$4 sm:$0xff]   ;;  %v4630_v15 = vld [vmem:[%s6922_s3 + $0xc0] ss:$16 sps:$4 sm:$0xff]   ;;  %s4044_s27 = sshll.u32 %s6938_s29, 3  ;;  %vm431_vm1 = vcmask 818176  }
  0x19   : > { %449 = vmatprep.subr.bf16.mxu0 %v4601_v3  ;;  %917 = vmatpush1.bf16.msra.mxu1 %v4624_v13  ;;  %v4631_v16 = vld [vmem:[%s6922_s3 + $0xa4] ss:$16 sps:$4 sm:$0xff]   ;;  %v4612_v17 = vld [vmem:[%s6920_s1 + $0x20] ss:$8 sps:$4 sm:$0xff]   ;;  %s331_s23 = scalar_lea.vmem %s6919_s0, %s4044_s27  ;;  %v4615_v21 = vld [vmem:[%s6920_s1 + $0x10] ss:$8 sps:$4 sm:$0xff]  }
  0x1a   : > { %918 = vmatprep.subr.bf16.mxu1 %v4625_v14  ;;  %v4613_v18 = vld [vmem:[%s6920_s1 + $0x14] ss:$8 sps:$4 sm:$0xff]   ;;  %v4636_v19 = vld [vmem:[%s6922_s3 + $0xa0] ss:$16 sps:$4 sm:$0xff]   ;;  %v4616_v22 = vld [vmem:[%s6920_s1 + $0x4] ss:$8 sps:$4 sm:$0xff]  }
  0x1b   : > { %v4637_v20 = vld [vmem:[%s6922_s3 + $0x84] ss:$16 sps:$4 sm:$0xff]   ;;  %v4618_v23 = vld [vmem:[%s6920_s1] ss:$8 sps:$4 sm:$0xff]   ;;  %v4623_v28 = vld [vmem:[%s6922_s3 + $0xec] ss:$16 sps:$4 sm:$0xff]  }
  0x1c   : > { %450 = vmatpush1.bf16.msra.mxu0 %v4603_v6  ;;  %v335_v24 = vld [vmem:[%s331_s23] sm:$0xff]  ;;  %v336_v27 = vld [vmem:[%s331_s23 + $0x8] sm:$0xff]  ;;  %v337_v34 = vld [vmem:[%s331_s23 + $0x10] sm:$0xff]  ;;  %vm3939_vm2 = vcmask 130048   ;;  %s5233_s29 = scalar_lea.vmem %s5232_s24, 7168 }
  0x1d   : > { %451 = vmatprep.subr.bf16.mxu0 %v4604_v7  ;;  %919 = vmatpush1.bf16.msra.mxu1 %v4630_v15  ;;  %v4642_v25 = vld [vmem:[%s6922_s3 + $0x80] ss:$16 sps:$4 sm:$0xff]   ;;  %v4643_v26 = vld [vmem:[%s6922_s3 + $0x64] ss:$16 sps:$4 sm:$0xff]   ;;  %v339_v30 = vpack.c.bf16 %v336_v27, %v335_v24  ;;  %v4621_v32 = vld [vmem:[%s6922_s3 + $0xe8] ss:$16 sps:$4 sm:$0xff]  }
  0x1e   : > { %920 = vmatprep.subr.bf16.mxu1 %v4631_v16  ;;  %v4648_v29 = vld [vmem:[%s6922_s3 + $0x60] ss:$16 sps:$4 sm:$0xff]   ;;  %v4649_v31 = vld [vmem:[%s6922_s3 + $0x44] ss:$16 sps:$4 sm:$0xff]   ;;  %v4629_v33 = vld [vmem:[%s6922_s3 + $0xcc] ss:$16 sps:$4 sm:$0xff]  }
  0x1f   : > { %v338_v35 = vld [vmem:[%s331_s23 + $0x18] sm:$0xff]  ;;  %v4654_v36 = vld [vmem:[%s6922_s3 + $0x40] ss:$16 sps:$4 sm:$0xff]   ;;  %v4655_v37 = vld [vmem:[%s6922_s3 + $0x24] ss:$16 sps:$4 sm:$0xff]   ;;  %s324_s23 = sand.u32 1, %s5279_s10  }
  0x20   : > { %452 = vmatpush1.bf16.msra.mxu0 %v4606_v8  ;;  %v4627_v38 = vld [vmem:[%s6922_s3 + $0xc8] ss:$16 sps:$4 sm:$0xff]   ;;  %v4635_v39 = vld [vmem:[%s6922_s3 + $0xac] ss:$16 sps:$4 sm:$0xff]   ;;  %v4660_v40 = vld [vmem:[%s6922_s3 + $0x20] ss:$16 sps:$4 sm:$0xff]   ;;  %v340_v41 = vpack.c.bf16 %v338_v35, %v337_v34 }
  0x21   : > { %453 = vmatprep.subr.bf16.mxu0 %v4607_v9  ;;  %921 = vmatpush1.bf16.msra.mxu1 %v4636_v19  ;;  %v4661_v42 = vld [vmem:[%s6922_s3 + $0x4] ss:$16 sps:$4 sm:$0xff]   ;;  %v4633_v43 = vld [vmem:[%s6922_s3 + $0xa8] ss:$16 sps:$4 sm:$0xff]   ;;  %v4641_v44 = vld [vmem:[%s6922_s3 + $0x8c] ss:$16 sps:$4 sm:$0xff]  }
  0x22   : > { %922 = vmatprep.subr.bf16.mxu1 %v4637_v20  ;;  %v4666_v45 = vld [vmem:[%s6922_s3] ss:$16 sps:$4 sm:$0xff]   ;;  %v4667_v46 = vld [vmem:[%s6922_s3 + $0x1e4] ss:$16 sps:$4 sm:$0xff]   ;;  %v4639_v47 = vld [vmem:[%s6922_s3 + $0x88] ss:$16 sps:$4 sm:$0xff]  }
  0x23   : > { %v4647_v48 = vld [vmem:[%s6922_s3 + $0x6c] ss:$16 sps:$4 sm:$0xff]   ;;  %v4672_v49 = vld [vmem:[%s6922_s3 + $0x1e0] ss:$16 sps:$4 sm:$0xff]   ;;  %v4645_v50 = vld [vmem:[%s6922_s3 + $0x68] ss:$16 sps:$4 sm:$0xff]  }
  0x24   : > { %454 = vmatpush1.bf16.msra.mxu0 %v4609_v11  ;;  %v4673_v51 = vld [vmem:[%s6922_s3 + $0x1c4] ss:$16 sps:$4 sm:$0xff]   ;;  %v4653_v52 = vld [vmem:[%s6922_s3 + $0x4c] ss:$16 sps:$4 sm:$0xff]   ;;  %v4678_v53 = vld [vmem:[%s6922_s3 + $0x1c0] ss:$16 sps:$4 sm:$0xff]  }
  0x25   : > { %455 = vmatprep.subr.bf16.mxu0 %v4610_v12  ;;  %923 = vmatpush1.bf16.msra.mxu1 %v4642_v25  ;;  %v4679_v54 = vld [vmem:[%s6922_s3 + $0x1a4] ss:$16 sps:$4 sm:$0xff]   ;;  %v4651_v55 = vld [vmem:[%s6922_s3 + $0x48] ss:$16 sps:$4 sm:$0xff]   ;;  %v4659_v56 = vld [vmem:[%s6922_s3 + $0x2c] ss:$16 sps:$4 sm:$0xff]   ;;  %v356_v25 = vlaneseq }
  0x26   : > { %924 = vmatprep.subr.bf16.mxu1 %v4643_v26  ;;  %v4684_v57 = vld [vmem:[%s6922_s3 + $0x1a0] ss:$16 sps:$4 sm:$0xff]   ;;  %v4685_v58 = vld [vmem:[%s6922_s3 + $0x184] ss:$16 sps:$4 sm:$0xff]   ;;  %v4657_v59 = vld [vmem:[%s6922_s3 + $0x28] ss:$16 sps:$4 sm:$0xff]  }
  0x27   : > { %v4665_v60 = vld [vmem:[%s6922_s3 + $0xc] ss:$16 sps:$4 sm:$0xff]   ;;  %v4690_v61 = vld [vmem:[%s6922_s3 + $0x180] ss:$16 sps:$4 sm:$0xff]   ;;  %v4691_v62 = vld [vmem:[%s6922_s3 + $0x164] ss:$16 sps:$4 sm:$0xff]  }
  0x28   : > { %456 = vmatpush1.bf16.msra.mxu0 %v4612_v17  ;;  %v4663_v63 = vld [vmem:[%s6922_s3 + $0x8] ss:$16 sps:$4 sm:$0xff]   ;;  %v4671_v0 = vld [vmem:[%s6922_s3 + $0x1ec] ss:$16 sps:$4 sm:$0xff]   ;;  %v4696_v1 = vld [vmem:[%s6922_s3 + $0x160] ss:$16 sps:$4 sm:$0xff]  }
  0x29   : > { %457 = vmatprep.subr.bf16.mxu0 %v4613_v18  ;;  %925 = vmatpush1.bf16.msra.mxu1 %v4648_v29  ;;  %v4669_v2 = vld [vmem:[%s6922_s3 + $0x1e8] ss:$16 sps:$4 sm:$0xff]   ;;  %v4677_v3 = vld [vmem:[%s6922_s3 + $0x1cc] ss:$16 sps:$4 sm:$0xff]   ;;  %v4697_v11 = vld [vmem:[%s6922_s3 + $0x144] ss:$16 sps:$4 sm:$0xff]  }
  0x2a   : > { %926 = vmatprep.subr.bf16.mxu1 %v4649_v31  ;;  %v4683_v5 = vld [vmem:[%s6922_s3 + $0x1ac] ss:$16 sps:$4 sm:$0xff]   ;;  %v4681_v6 = vld [vmem:[%s6922_s3 + $0x1a8] ss:$16 sps:$4 sm:$0xff]   ;;  %v4702_v14 = vld [vmem:[%s6922_s3 + $0x140] ss:$16 sps:$4 sm:$0xff]  }
  0x2b   : > { %v4689_v7 = vld [vmem:[%s6922_s3 + $0x18c] ss:$16 sps:$4 sm:$0xff]   ;;  %v4687_v8 = vld [vmem:[%s6922_s3 + $0x188] ss:$16 sps:$4 sm:$0xff]   ;;  %v4703_v15 = vld [vmem:[%s6922_s3 + $0x124] ss:$16 sps:$4 sm:$0xff]  }
  0x2c   : > { %458 = vmatpush1.bf16.msra.mxu0 %v4615_v21  ;;  %v4695_v9 = vld [vmem:[%s6922_s3 + $0x16c] ss:$16 sps:$4 sm:$0xff]   ;;  %v4693_v10 = vld [vmem:[%s6922_s3 + $0x168] ss:$16 sps:$4 sm:$0xff]   ;;  %v4708_v18 = vld [vmem:[%s6922_s3 + $0x120] ss:$16 sps:$4 sm:$0xff]  }
  0x2d   : > { %459 = vmatprep.subr.bf16.mxu0 %v4616_v22  ;;  %927 = vmatpush1.bf16.msra.mxu1 %v4654_v36  ;;  %v4701_v12 = vld [vmem:[%s6922_s3 + $0x14c] ss:$16 sps:$4 sm:$0xff]   ;;  %v4699_v13 = vld [vmem:[%s6922_s3 + $0x148] ss:$16 sps:$4 sm:$0xff]   ;;  %v4709_v19 = vld [vmem:[%s6922_s3 + $0x104] ss:$16 sps:$4 sm:$0xff]  }
  0x2e   : > { %928 = vmatprep.subr.bf16.mxu1 %v4655_v37  ;;  %v4707_v16 = vld [vmem:[%s6922_s3 + $0x12c] ss:$16 sps:$4 sm:$0xff]   ;;  %v4705_v17 = vld [vmem:[%s6922_s3 + $0x128] ss:$16 sps:$4 sm:$0xff]   ;;  %v4714_v22 = vld [vmem:[%s6922_s3 + $0x100] ss:$16 sps:$4 sm:$0xff]  }
  0x2f   : > { %v4713_v20 = vld [vmem:[%s6922_s3 + $0x10c] ss:$16 sps:$4 sm:$0xff]   ;;  %v4711_v21 = vld [vmem:[%s6922_s3 + $0x108] ss:$16 sps:$4 sm:$0xff]   ;;  %v4720_v24 = vld [vmem:[%s6924_s5 + $0x2e4] ss:$16 sps:$4 sm:$0xff]  }
  0x30   : > { %460 = vmatpush1.bf16.msra.mxu0 %v4618_v23  ;;  %v4717_v23 = vld [vmem:[%s6924_s5 + $0xe4] ss:$16 sps:$4 sm:$0xff]   ;;  %v5636_v26 = vshrl.u32 %v356_v25, 7  ;;  %v354_v29 = vld [vmem:[%s6921_s2] sm:$0x3]  ;;  %s4555_s26 = smul.u32 224, %s324_s23 }
  0x31   : > { %969 = vmatprep.subr.bf16.mxu0 %v4623_v28  ;;  %929 = vmatpush1.bf16.msra.mxu1 %v4660_v40  ;;  %v4760_v25 = vld [vmem:[%s6924_s5 + $0x200] ss:$16 sps:$4 sm:$0xff]   ;;  %s6879_s13 = scalar_lea.sflag [#allocation3], %s324_s23 }
  0x32   : > { %930 = vmatprep.subr.bf16.mxu1 %v4661_v42  ;;  %v5639_v27 = vsub.s32 1, %v5636_v26  ;;  %v5642_v28 = vsub.s32 0, %v5636_v26  ;;  %s6821_s28 = scalar_lea.vmem [#allocation2], %s4555_s26 }
  0x33   : > { %4060 = vmatmul.mubr.msk.bf16.vlgmr.msra.gmra.mxu0 %vm431_vm1, %v339_v30  ;;  %s3977_s16 = sshll.u32 %s6821_s28, 4  ;;  %s6873_s16 = int_to_ptr.vmem [resolvable:$true] %s3977_s16 }
  0x34   : > { %487 = vmatprep.mubr.bf16.mxu0 %v5289_v4  ;;  %970 = vmatpush1.bf16.msra.mxu0 %v4621_v32  ;;  %v4675_v4 = vld [vmem:[%s6922_s3 + $0x1c8] ss:$16 sps:$4 sm:$0xff]   ;;  %v363_v31 = vrot.slane %v354_v29, %v5639_v27  ;;  %v359_v32 = vrot.slane %v354_v29, %v5642_v28  ;;  %v4765_v29 = vld [vmem:[%s6924_s5 + $0x1e4] ss:$16 sps:$4 sm:$0xff]   ;;  %s5227_s21 = scalar_lea.vmem %s6873_s16, 3584  ;;  %p5234_p0 = scmp.lt.s32.totalorder %s6873_s16, %s5232_s24 }
  0x35   : > { %971 = vmatprep.subr.bf16.mxu0 %v4629_v33  ;;  %931 = vmatpush1.bf16.msra.mxu1 %v4666_v45  ;;  %p5228_p11 = scmp.ne.s32.totalorder %s6873_s16, %s5227_s21  ;;  %p5235_p1 = scmp.lt.s32.totalorder %s5233_s29, %s5227_s21 }
  0x36   : > { %932 = vmatprep.subr.bf16.mxu1 %v4667_v46 }
  0x37   : > { %p5229_p12 = pnand %p5228_p11, %p5381_p5  ;;  %p5236_p2 = por %p5235_p1, %p5234_p0 }
  0x38   : > { %972 = vmatpush1.bf16.msra.mxu0 %v4627_v38 }
  0x39   : > { %973 = vmatprep.subr.bf16.mxu0 %v4635_v39  ;;  %933 = vmatpush2.bf16.msra.mxu1 %v4672_v49  ;;  %v4715_v49 = vld [vmem:[%s6924_s5 + $0xe0] ss:$16 sps:$4 sm:$0xff]   ;;  %p5230_p13 = pneg %p5229_p12 }
  0x3a   : > { %934 = vmatprep.subr.bf16.mxu1 %v4673_v51 }
  0x3b   : > { %4061 = vmatmul.mubr.msk.bf16.gmra.mxu0 %vm431_vm1, %v340_v41  ;;  %p5237_p3 = pnand %p5236_p2, %p5230_p13 }
  0x3c   : > { %974 = vmatpush1.bf16.msra.mxu0 %v4633_v43 }
  0x3d   : > { %975 = vmatprep.subr.bf16.mxu0 %v4641_v44  ;;  %935 = vmatpush2.bf16.msra.mxu1 %v4678_v53  ;;  %v4723_v53 = vld [vmem:[%s6924_s5 + $0xc4] ss:$16 sps:$4 sm:$0xff]  }
  0x3e   : > { %936 = vmatprep.subr.bf16.mxu1 %v4679_v54  ;;  %v4726_v54 = vld [vmem:[%s6924_s5 + $0x2c4] ss:$16 sps:$4 sm:$0xff]  }
  0x40   : > { %976 = vmatpush1.bf16.msra.mxu0 %v4639_v47 }
  0x41   : > { %977 = vmatprep.subr.bf16.mxu0 %v4647_v48  ;;  %937 = vmatpush2.bf16.msra.mxu1 %v4684_v57 }
  0x42   : > { %938 = vmatprep.subr.bf16.mxu1 %v4685_v58 }
  0x44   : > { %978 = vmatpush1.bf16.msra.mxu0 %v4645_v50  ;;  %v4718_v50 = vld [vmem:[%s6924_s5 + $0x2e0] ss:$16 sps:$4 sm:$0xff]  }
  0x45   : > { %979 = vmatprep.subr.bf16.mxu0 %v4653_v52  ;;  %939 = vmatpush2.bf16.msra.mxu1 %v4690_v61  ;;  %v4721_v61 = vld [vmem:[%s6924_s5 + $0xc0] ss:$16 sps:$4 sm:$0xff]  }
  0x46   : > { %940 = vmatprep.subr.bf16.mxu1 %v4691_v62  ;;  %v4724_v62 = vld [vmem:[%s6924_s5 + $0x2c0] ss:$16 sps:$4 sm:$0xff]  }
  0x48   : > { %980 = vmatpush1.bf16.msra.mxu0 %v4651_v55 }
  0x49   : > { %981 = vmatprep.subr.bf16.mxu0 %v4659_v56  ;;  %941 = vmatpush2.bf16.msra.mxu1 %v4696_v1 }
  0x4a   : > { %942 = vmatprep.subr.bf16.mxu1 %v4697_v11  ;;  %v4744_v11 = vld [vmem:[%s6924_s5 + $0x264] ss:$16 sps:$4 sm:$0xff]  }
  0x4c   : > { %982 = vmatpush1.bf16.msra.mxu0 %v4657_v59 }
  0x4d   : > { %983 = vmatprep.subr.bf16.mxu0 %v4665_v60  ;;  %943 = vmatpush2.bf16.msra.mxu1 %v4702_v14  ;;  %v4747_v14 = vld [vmem:[%s6924_s5 + $0x44] ss:$16 sps:$4 sm:$0xff]  }
  0x4e   : > { %944 = vmatprep.subr.bf16.mxu1 %v4703_v15  ;;  %v4750_v15 = vld [vmem:[%s6924_s5 + $0x244] ss:$16 sps:$4 sm:$0xff]  }
  0x50   : > { %984 = vmatpush1.bf16.msra.mxu0 %v4663_v63  ;;  %v4729_v63 = vld [vmem:[%s6924_s5 + $0xa4] ss:$16 sps:$4 sm:$0xff]  }
  0x51   : > { %985 = vmatprep.subr.bf16.mxu0 %v4671_v0  ;;  %945 = vmatpush2.bf16.msra.mxu1 %v4708_v18  ;;  %v4732_v0 = vld [vmem:[%s6924_s5 + $0x2a4] ss:$16 sps:$4 sm:$0xff]  }
  0x52   : > { %946 = vmatprep.subr.bf16.mxu1 %v4709_v19  ;;  %v4753_v18 = vld [vmem:[%s6924_s5 + $0x24] ss:$16 sps:$4 sm:$0xff]  }
  0x53   : > { %v4756_v19 = vld [vmem:[%s6924_s5 + $0x224] ss:$16 sps:$4 sm:$0xff]  }
  0x54   : > { %986 = vmatpush2.bf16.msra.mxu0 %v4669_v2 }
  0x55   : > { %987 = vmatprep.subr.bf16.mxu0 %v4677_v3  ;;  %947 = vmatpush2.bf16.msra.mxu1 %v4714_v22  ;;  %v4759_v22 = vld [vmem:[%s6924_s5 + $0x4] ss:$16 sps:$4 sm:$0xff]  }
  0x56   : > { %1836 = vmatprep.subr.bf16.mxu1 %v4717_v23  ;;  %v4762_v23 = vld [vmem:[%s6924_s5 + $0x204] ss:$16 sps:$4 sm:$0xff]  }
  0x58   : > { %988 = vmatpush2.bf16.msra.mxu0 %v4675_v4  ;;  %v4727_v4 = vld [vmem:[%s6924_s5 + $0xa0] ss:$16 sps:$4 sm:$0xff]  }
  0x59   : > { %989 = vmatprep.subr.bf16.mxu0 %v4683_v5  ;;  %v4730_v5 = vld [vmem:[%s6924_s5 + $0x2a0] ss:$16 sps:$4 sm:$0xff]  }
  0x5c   : > { %990 = vmatpush2.bf16.msra.mxu0 %v4681_v6  ;;  %v4735_v6 = vld [vmem:[%s6924_s5 + $0x84] ss:$16 sps:$4 sm:$0xff]  }
  0x5d   : > { %991 = vmatprep.subr.bf16.mxu0 %v4689_v7  ;;  %v4738_v7 = vld [vmem:[%s6924_s5 + $0x284] ss:$16 sps:$4 sm:$0xff]  }
  0x60   : > { %992 = vmatpush2.bf16.msra.mxu0 %v4687_v8  ;;  %v4733_v8 = vld [vmem:[%s6924_s5 + $0x80] ss:$16 sps:$4 sm:$0xff]  }
  0x61   : > { %993 = vmatprep.subr.bf16.mxu0 %v4695_v9  ;;  %v4736_v9 = vld [vmem:[%s6924_s5 + $0x280] ss:$16 sps:$4 sm:$0xff]  }
  0x64   : > { %994 = vmatpush2.bf16.msra.mxu0 %v4693_v10  ;;  %v4741_v10 = vld [vmem:[%s6924_s5 + $0x64] ss:$16 sps:$4 sm:$0xff]  }
  0x65   : > { %995 = vmatprep.subr.bf16.mxu0 %v4701_v12  ;;  %v4739_v12 = vld [vmem:[%s6924_s5 + $0x60] ss:$16 sps:$4 sm:$0xff]  }
  0x68   : > { %996 = vmatpush2.bf16.msra.mxu0 %v4699_v13  ;;  %v4742_v13 = vld [vmem:[%s6924_s5 + $0x260] ss:$16 sps:$4 sm:$0xff]  }
  0x69   : > { %997 = vmatprep.subr.bf16.mxu0 %v4707_v16  ;;  %v4745_v16 = vld [vmem:[%s6924_s5 + $0x40] ss:$16 sps:$4 sm:$0xff]  }
  0x6c   : > { %998 = vmatpush2.bf16.msra.mxu0 %v4705_v17  ;;  %v4748_v17 = vld [vmem:[%s6924_s5 + $0x240] ss:$16 sps:$4 sm:$0xff]  }
  0x6d   : > { %999 = vmatprep.subr.bf16.mxu0 %v4713_v20  ;;  %v4751_v20 = vld [vmem:[%s6924_s5 + $0x20] ss:$16 sps:$4 sm:$0xff]  }
  0x70   : > { %1000 = vmatpush2.bf16.msra.mxu0 %v4711_v21  ;;  %v4754_v21 = vld [vmem:[%s6924_s5 + $0x220] ss:$16 sps:$4 sm:$0xff]  }
  0x71   : > { %1889 = vmatprep.subr.bf16.mxu0 %v4720_v24  ;;  %v4757_v24 = vld [vmem:[%s6924_s5] ss:$16 sps:$4 sm:$0xff]  }
  0xf3   : > { %v479_v30 = vpop.f32.mrf.mxu0 }
  0xf4   : > { %v480_v37 = vadd.f32 %v479_v30, %v359_v32  ;;  %v4768_v30 = vld [vmem:[%s6924_s5 + $0x3e4] ss:$16 sps:$4 sm:$0xff]  }
  0xf5   : > { %v481_v33 = vpop.f32.mrf.mxu0 }
  0xf6   : > { %v482_v35 = vadd.f32 %v481_v33, %v363_v31  ;;  %v498_v44 = vmax.f32 %v480_v37, 0.0  ;;  %v4771_v33 = vld [vmem:[%s6924_s5 + $0x1c4] ss:$16 sps:$4 sm:$0xff]  }
  0xf7   : > { %v483_v34 = vpop.f32.mrf.mxu0  ;;  %v4777_v37 = vld [vmem:[%s6924_s5 + $0x1a4] ss:$16 sps:$4 sm:$0xff]  }
  0xf8   : > { %v484_v36 = vadd.f32 %v483_v34, %v359_v32  ;;  %v499_v42 = vmax.f32 %v482_v35, 0.0  ;;  %v4774_v34 = vld [vmem:[%s6924_s5 + $0x3c4] ss:$16 sps:$4 sm:$0xff]   ;;  %v4769_v35 = vld [vmem:[%s6924_s5 + $0x1c0] ss:$16 sps:$4 sm:$0xff]  }
  0xf9   : > { %v485_v38 = vpop.f32.mrf.mxu0 }
  0xfa   : > { %v486_v39 = vadd.f32 %v485_v38, %v363_v31  ;;  %v500_v40 = vmax.f32 %v484_v36, 0.0  ;;  %v4772_v36 = vld [vmem:[%s6924_s5 + $0x3c0] ss:$16 sps:$4 sm:$0xff]   ;;  %v4780_v38 = vld [vmem:[%s6924_s5 + $0x3a4] ss:$16 sps:$4 sm:$0xff]  }
  0xfb   : > { %v489_v41 = vpop.f32.mrf.mxu0 }
  0xfc   : > { %v501_v43 = vmax.f32 %v486_v39, 0.0  ;;  %v490_v45 = vadd.f32 %v489_v41, %v359_v32  ;;  %v506_v51 = vpack.c.bf16 %v500_v40, %v498_v44  ;;  %v4775_v39 = vld [vmem:[%s6924_s5 + $0x1a0] ss:$16 sps:$4 sm:$0xff]   ;;  %v4783_v41 = vld [vmem:[%s6924_s5 + $0x184] ss:$16 sps:$4 sm:$0xff]  }
  0xfd   : > { %v491_v46 = vpop.f32.mrf.mxu0  ;;  %v4778_v40 = vld [vmem:[%s6924_s5 + $0x3a0] ss:$16 sps:$4 sm:$0xff]  }
  0xfe   : > { %v492_v47 = vadd.f32 %v491_v46, %v363_v31  ;;  %v507_v48 = vpack.c.bf16 %v501_v43, %v499_v42  ;;  %v502_v56 = vmax.f32 %v490_v45, 0.0  ;;  %v4786_v42 = vld [vmem:[%s6924_s5 + $0x384] ss:$16 sps:$4 sm:$0xff]   ;;  %v4781_v43 = vld [vmem:[%s6924_s5 + $0x180] ss:$16 sps:$4 sm:$0xff]  }
  0xff   : > { %v493_v52 = vpop.f32.mrf.mxu0  ;;  %v4784_v44 = vld [vmem:[%s6924_s5 + $0x380] ss:$16 sps:$4 sm:$0xff]   ;;  %v4789_v45 = vld [vmem:[%s6924_s5 + $0x164] ss:$16 sps:$4 sm:$0xff]  }
 0x100   : > { %v494_v55 = vadd.f32 %v493_v52, %v359_v32  ;;  %948 = vmatprep.mubr.bf16.mxu1 %v507_v48  ;;  %1001 = vmatprep.mubr.bf16.mxu0 %v507_v48  ;;  %v503_v58 = vmax.f32 %v492_v47, 0.0  ;;  %v4766_v32 = vld [vmem:[%s6924_s5 + $0x3e0] ss:$16 sps:$4 sm:$0xff]   ;;  %v4792_v46 = vld [vmem:[%s6924_s5 + $0x364] ss:$16 sps:$4 sm:$0xff]  }
 0x101   : > { %v495_v57 = vpop.f32.mrf.mxu0  ;;  %949 = vmatmul.mubr.bf16.vlgmr.msra.gmra.mxu1 %v506_v51  ;;  %1002 = vmatmul.mubr.bf16.vlgmr.msra.gmra.mxu0 %v506_v51  ;;  %v4787_v47 = vld [vmem:[%s6924_s5 + $0x160] ss:$16 sps:$4 sm:$0xff]  }
 0x102   : > { %v504_v59 = vmax.f32 %v494_v55, 0.0  ;;  %v496_v60 = vadd.f32 %v495_v57, %v363_v31  ;;  %1837 = vmatpush1.bf16.msra.mxu1 %v4715_v49  ;;  %1890 = vmatpush1.bf16.msra.mxu0 %v4718_v50  ;;  %v4763_v31 = vld [vmem:[%s6924_s5 + $0x1e0] ss:$16 sps:$4 sm:$0xff]   ;;  %v4795_v49 = vld [vmem:[%s6924_s5 + $0x144] ss:$16 sps:$4 sm:$0xff]  }
 0x103   : > { %1838 = vmatprep.subr.bf16.mxu1 %v4723_v53  ;;  %1891 = vmatprep.subr.bf16.mxu0 %v4726_v54  ;;  %v4790_v48 = vld [vmem:[%s6924_s5 + $0x360] ss:$16 sps:$4 sm:$0xff]   ;;  %v4798_v50 = vld [vmem:[%s6924_s5 + $0x344] ss:$16 sps:$4 sm:$0xff]  }
 0x104   : > { %v505_v1 = vmax.f32 %v496_v60, 0.0  ;;  %v508_v2 = vpack.c.bf16 %v504_v59, %v502_v56  ;;  %v4793_v51 = vld [vmem:[%s6924_s5 + $0x140] ss:$16 sps:$4 sm:$0xff]   ;;  %v4801_v53 = vld [vmem:[%s6924_s5 + $0x124] ss:$16 sps:$4 sm:$0xff]  }
 0x105   : > { %v4796_v52 = vld [vmem:[%s6924_s5 + $0x340] ss:$16 sps:$4 sm:$0xff]   ;;  %v4804_v54 = vld [vmem:[%s6924_s5 + $0x324] ss:$16 sps:$4 sm:$0xff]  }
 0x106   : > { %v509_v3 = vpack.c.bf16 %v505_v1, %v503_v58  ;;  %1839 = vmatpush1.bf16.msra.mxu1 %v4721_v61  ;;  %1892 = vmatpush1.bf16.msra.mxu0 %v4724_v62  ;;  %v4799_v55 = vld [vmem:[%s6924_s5 + $0x120] ss:$16 sps:$4 sm:$0xff]   ;;  %v4807_v57 = vld [vmem:[%s6924_s5 + $0x104] ss:$16 sps:$4 sm:$0xff]   ;;  %v4813_v61 = vld [vmem:[%s6924_s5 + $0xec] ss:$16 sps:$4 sm:$0xff]  }
 0x107   : > { %1840 = vmatprep.subr.bf16.mxu1 %v4729_v63  ;;  %1893 = vmatprep.subr.bf16.mxu0 %v4732_v0  ;;  %v4802_v56 = vld [vmem:[%s6924_s5 + $0x320] ss:$16 sps:$4 sm:$0xff]   ;;  %v4810_v58 = vld [vmem:[%s6924_s5 + $0x304] ss:$16 sps:$4 sm:$0xff]   ;;  %v4816_v62 = vld [vmem:[%s6924_s5 + $0x2ec] ss:$16 sps:$4 sm:$0xff]  }
 0x108   : > { %958 = vmatprep.mubr.bf16.mxu1 %v509_v3  ;;  %1011 = vmatprep.mubr.bf16.mxu0 %v509_v3  ;;  %v4805_v59 = vld [vmem:[%s6924_s5 + $0x100] ss:$16 sps:$4 sm:$0xff]   ;;  %v5842_v63 = vsub.s32 3, %v5636_v26  ;;  %v5845_v0 = vsub.s32 2, %v5636_v26 }
 0x109   : > { %959 = vmatmul.mubr.bf16.gmra.mxu1 %v508_v2  ;;  %1012 = vmatmul.mubr.bf16.gmra.mxu0 %v508_v2  ;;  %v4808_v60 = vld [vmem:[%s6924_s5 + $0x300] ss:$16 sps:$4 sm:$0xff]  }
 0x10a   : > { %1841 = vmatpush1.bf16.msra.mxu1 %v4727_v4  ;;  %1894 = vmatpush1.bf16.msra.mxu0 %v4730_v5  ;;  %v574_v1 = vld [vmem:[%s6923_s4] sm:$0xf] }
 0x10b   : > { %1842 = vmatprep.subr.bf16.mxu1 %v4735_v6  ;;  %1895 = vmatprep.subr.bf16.mxu0 %v4738_v7  ;;  %v583_v4 = vrot.slane %v574_v1, %v5639_v27  ;;  %v591_v5 = vrot.slane %v574_v1, %v5842_v63  ;;  %v579_v6 = vrot.slane %v574_v1, %v5642_v28 }
 0x10c   : > { %v587_v7 = vrot.slane %v574_v1, %v5845_v0  ;;  %v4817_v1 = vld [vmem:[%s6924_s5 + $0xc8] ss:$16 sps:$4 sm:$0xff]  }
 0x10e   : > { %1843 = vmatpush1.bf16.msra.mxu1 %v4733_v8  ;;  %1896 = vmatpush1.bf16.msra.mxu0 %v4736_v9 }
 0x10f   : > { %1844 = vmatprep.subr.bf16.mxu1 %v4741_v10  ;;  %1897 = vmatprep.subr.bf16.mxu0 %v4744_v11 }
 0x112   : > { %1845 = vmatpush1.bf16.msra.mxu1 %v4739_v12  ;;  %1898 = vmatpush1.bf16.msra.mxu0 %v4742_v13 }
 0x113   : > { %1846 = vmatprep.subr.bf16.mxu1 %v4747_v14  ;;  %1899 = vmatprep.subr.bf16.mxu0 %v4750_v15 }
 0x116   : > { %1847 = vmatpush1.bf16.msra.mxu1 %v4745_v16  ;;  %1900 = vmatpush1.bf16.msra.mxu0 %v4748_v17 }
 0x117   : > { %1848 = vmatprep.subr.bf16.mxu1 %v4753_v18  ;;  %1901 = vmatprep.subr.bf16.mxu0 %v4756_v19 }
 0x11a   : > { %1849 = vmatpush1.bf16.msra.mxu1 %v4751_v20  ;;  %1902 = vmatpush1.bf16.msra.mxu0 %v4754_v21 }
 0x11b   : > { %1850 = vmatprep.subr.bf16.mxu1 %v4759_v22  ;;  %1903 = vmatprep.subr.bf16.mxu0 %v4762_v23 }
 0x11e   : > { %1851 = vmatpush1.bf16.msra.mxu1 %v4757_v24  ;;  %1904 = vmatpush1.bf16.msra.mxu0 %v4760_v25 }
 0x11f   : > { %1852 = vmatprep.subr.bf16.mxu1 %v4765_v29  ;;  %1905 = vmatprep.subr.bf16.mxu0 %v4768_v30 }
 0x122   : > { %1853 = vmatpush2.bf16.msra.mxu1 %v4763_v31  ;;  %1906 = vmatpush2.bf16.msra.mxu0 %v4766_v32 }
 0x123   : > { %1854 = vmatprep.subr.bf16.mxu1 %v4771_v33  ;;  %1907 = vmatprep.subr.bf16.mxu0 %v4774_v34 }
 0x126   : > { %1855 = vmatpush2.bf16.msra.mxu1 %v4769_v35  ;;  %1908 = vmatpush2.bf16.msra.mxu0 %v4772_v36 }
 0x127   : > { %1856 = vmatprep.subr.bf16.mxu1 %v4777_v37  ;;  %1909 = vmatprep.subr.bf16.mxu0 %v4780_v38 }
 0x12a   : > { %1857 = vmatpush2.bf16.msra.mxu1 %v4775_v39  ;;  %1910 = vmatpush2.bf16.msra.mxu0 %v4778_v40 }
 0x12b   : > { %1858 = vmatprep.subr.bf16.mxu1 %v4783_v41  ;;  %1911 = vmatprep.subr.bf16.mxu0 %v4786_v42 }
 0x12e   : > { %1859 = vmatpush2.bf16.msra.mxu1 %v4781_v43  ;;  %1912 = vmatpush2.bf16.msra.mxu0 %v4784_v44  ;;  %v4811_v43 = vld [vmem:[%s6924_s5 + $0xe8] ss:$16 sps:$4 sm:$0xff]  }
 0x12f   : > { %1860 = vmatprep.subr.bf16.mxu1 %v4789_v45  ;;  %1913 = vmatprep.subr.bf16.mxu0 %v4792_v46  ;;  %v4814_v44 = vld [vmem:[%s6924_s5 + $0x2e8] ss:$16 sps:$4 sm:$0xff]  }
 0x132   : > { %1861 = vmatpush2.bf16.msra.mxu1 %v4787_v47  ;;  %1914 = vmatpush2.bf16.msra.mxu0 %v4790_v48 }
 0x133   : > { %1862 = vmatprep.subr.bf16.mxu1 %v4795_v49  ;;  %1915 = vmatprep.subr.bf16.mxu0 %v4798_v50  ;;  %v4819_v49 = vld [vmem:[%s6924_s5 + $0xcc] ss:$16 sps:$4 sm:$0xff]  }
 0x134   : > { %v4822_v50 = vld [vmem:[%s6924_s5 + $0x2cc] ss:$16 sps:$4 sm:$0xff]  }
 0x136   : > { %1863 = vmatpush2.bf16.msra.mxu1 %v4793_v51  ;;  %1916 = vmatpush2.bf16.msra.mxu0 %v4796_v52 }
 0x137   : > { %1864 = vmatprep.subr.bf16.mxu1 %v4801_v53  ;;  %1917 = vmatprep.subr.bf16.mxu0 %v4804_v54 }
 0x13a   : > { %1865 = vmatpush2.bf16.msra.mxu1 %v4799_v55  ;;  %1918 = vmatpush2.bf16.msra.mxu0 %v4802_v56 }
 0x13b   : > { %1866 = vmatprep.subr.bf16.mxu1 %v4807_v57  ;;  %1919 = vmatprep.subr.bf16.mxu0 %v4810_v58 }
 0x13e   : > { %1867 = vmatpush2.bf16.msra.mxu1 %v4805_v59  ;;  %1920 = vmatpush2.bf16.msra.mxu0 %v4808_v60 }
 0x13f   : > { %1942 = vmatprep.subr.bf16.mxu1 %v4813_v61  ;;  %1995 = vmatprep.subr.bf16.mxu0 %v4816_v62 }
 0x1c1   : > { %v950_v2 = vpop.f32.mrf.mxu1  ;;  %v1003_v3 = vpop.f32.mrf.mxu0 }
 0x1c2   : > { %v951_v16 = vadd.f32 %v950_v2, %v579_v6  ;;  %v1004_v17 = vadd.f32 %v1003_v3, %v587_v7  ;;  %v4820_v2 = vld [vmem:[%s6924_s5 + $0x2c8] ss:$16 sps:$4 sm:$0xff]   ;;  %v4825_v3 = vld [vmem:[%s6924_s5 + $0xac] ss:$16 sps:$4 sm:$0xff]  }
 0x1c3   : > { %v952_v8 = vpop.f32.mrf.mxu1  ;;  %v1005_v9 = vpop.f32.mrf.mxu0 }
 0x1c4   : > { %v953_v12 = vadd.f32 %v952_v8, %v583_v4  ;;  %v1006_v13 = vadd.f32 %v1005_v9, %v591_v5  ;;  %v1022_v33 = vmax.f32 %v951_v16, 0.0  ;;  %v1024_v34 = vmax.f32 %v1004_v17, 0.0  ;;  %v4832_v16 = vld [vmem:[%s6924_s5 + $0x288] ss:$16 sps:$4 sm:$0xff]   ;;  %v4837_v17 = vld [vmem:[%s6924_s5 + $0x6c] ss:$16 sps:$4 sm:$0xff]  }
 0x1c5   : > { %v954_v10 = vpop.f32.mrf.mxu1  ;;  %v1007_v11 = vpop.f32.mrf.mxu0 }
 0x1c6   : > { %v955_v14 = vadd.f32 %v954_v10, %v579_v6  ;;  %v1008_v15 = vadd.f32 %v1007_v11, %v587_v7  ;;  %v1023_v29 = vmax.f32 %v953_v12, 0.0  ;;  %v1025_v30 = vmax.f32 %v1006_v13, 0.0  ;;  %v4823_v11 = vld [vmem:[%s6924_s5 + $0xa8] ss:$16 sps:$4 sm:$0xff]   ;;  %v4831_v13 = vld [vmem:[%s6924_s5 + $0x8c] ss:$16 sps:$4 sm:$0xff]  }
 0x1c7   : > { %v956_v18 = vpop.f32.mrf.mxu1  ;;  %v1009_v19 = vpop.f32.mrf.mxu0  ;;  %v4826_v12 = vld [vmem:[%s6924_s5 + $0x2a8] ss:$16 sps:$4 sm:$0xff]  }
 0x1c8   : > { %v957_v20 = vadd.f32 %v956_v18, %v583_v4  ;;  %v1010_v21 = vadd.f32 %v1009_v19, %v591_v5  ;;  %v1026_v22 = vmax.f32 %v955_v14, 0.0  ;;  %v1028_v23 = vmax.f32 %v1008_v15, 0.0  ;;  %v4834_v14 = vld [vmem:[%s6924_s5 + $0x28c] ss:$16 sps:$4 sm:$0xff]   ;;  %v4829_v15 = vld [vmem:[%s6924_s5 + $0x88] ss:$16 sps:$4 sm:$0xff]  }
 0x1c9   : > { %v960_v24 = vpop.f32.mrf.mxu1  ;;  %v1013_v25 = vpop.f32.mrf.mxu0  ;;  %v4840_v18 = vld [vmem:[%s6924_s5 + $0x26c] ss:$16 sps:$4 sm:$0xff]   ;;  %v4835_v19 = vld [vmem:[%s6924_s5 + $0x68] ss:$16 sps:$4 sm:$0xff]  }
 0x1ca   : > { %v1027_v31 = vmax.f32 %v957_v20, 0.0  ;;  %v1029_v32 = vmax.f32 %v1010_v21, 0.0  ;;  %v961_v35 = vadd.f32 %v960_v24, %v579_v6  ;;  %v1014_v36 = vadd.f32 %v1013_v25, %v587_v7  ;;  %v4838_v20 = vld [vmem:[%s6924_s5 + $0x268] ss:$16 sps:$4 sm:$0xff]   ;;  %v4843_v21 = vld [vmem:[%s6924_s5 + $0x4c] ss:$16 sps:$4 sm:$0xff]  }
 0x1cb   : > { %v962_v37 = vpop.f32.mrf.mxu1  ;;  %v1015_v38 = vpop.f32.mrf.mxu0  ;;  %v5860_v45 = vpack.c.bf16 %v1026_v22, %v1022_v33  ;;  %v5862_v46 = vpack.c.bf16 %v1028_v23, %v1024_v34  ;;  %v4846_v22 = vld [vmem:[%s6924_s5 + $0x24c] ss:$16 sps:$4 sm:$0xff]   ;;  %v4841_v23 = vld [vmem:[%s6924_s5 + $0x48] ss:$16 sps:$4 sm:$0xff]  }
 0x1cc   : > { %v1039_v39 = vpack.c.bf16 %v1027_v31, %v1023_v29  ;;  %v1041_v40 = vpack.c.bf16 %v1029_v32, %v1025_v30  ;;  %v963_v41 = vadd.f32 %v962_v37, %v583_v4  ;;  %v1016_v42 = vadd.f32 %v1015_v38, %v591_v5  ;;  %v4844_v24 = vld [vmem:[%s6924_s5 + $0x248] ss:$16 sps:$4 sm:$0xff]   ;;  %v4849_v25 = vld [vmem:[%s6924_s5 + $0x2c] ss:$16 sps:$4 sm:$0xff]  }
 0x1cd   : > { %v964_v47 = vpop.f32.mrf.mxu1  ;;  %v1017_v48 = vpop.f32.mrf.mxu0  ;;  %v1030_v53 = vmax.f32 %v961_v35, 0.0  ;;  %v1032_v54 = vmax.f32 %v1014_v36, 0.0  ;;  %v4852_v29 = vld [vmem:[%s6924_s5 + $0x22c] ss:$16 sps:$4 sm:$0xff]   ;;  %v4847_v30 = vld [vmem:[%s6924_s5 + $0x28] ss:$16 sps:$4 sm:$0xff]  }
 0x1ce   : > { %v965_v51 = vadd.f32 %v964_v47, %v579_v6  ;;  %v1018_v52 = vadd.f32 %v1017_v48, %v587_v7  ;;  %1868 = vmatprep.mubr.bf16.mxu1 %v1039_v39  ;;  %1921 = vmatprep.mubr.bf16.mxu0 %v1041_v40  ;;  %v1031_v55 = vmax.f32 %v963_v41, 0.0  ;;  %v1033_v56 = vmax.f32 %v1016_v42, 0.0  ;;  %v4850_v31 = vld [vmem:[%s6924_s5 + $0x228] ss:$16 sps:$4 sm:$0xff]   ;;  %v4855_v32 = vld [vmem:[%s6924_s5 + $0xc] ss:$16 sps:$4 sm:$0xff]  }
 0x1cf   : > { %v966_v57 = vpop.f32.mrf.mxu1  ;;  %v1019_v58 = vpop.f32.mrf.mxu0  ;;  %1869 = vmatmul.mubr.bf16.vlgmr.msra.gmra.mxu1 %v5860_v45  ;;  %1922 = vmatmul.mubr.bf16.vlgmr.msra.gmra.mxu0 %v5862_v46  ;;  %v4858_v33 = vld [vmem:[%s6924_s5 + $0x20c] ss:$16 sps:$4 sm:$0xff]   ;;  %v4853_v34 = vld [vmem:[%s6924_s5 + $0x8] ss:$16 sps:$4 sm:$0xff]  }
 0x1d0   : > { %v1034_v59 = vmax.f32 %v965_v51, 0.0  ;;  %v1036_v60 = vmax.f32 %v1018_v52, 0.0  ;;  %v967_v61 = vadd.f32 %v966_v57, %v583_v4  ;;  %v1020_v62 = vadd.f32 %v1019_v58, %v591_v5  ;;  %1943 = vmatpush1.bf16.msra.mxu1 %v4811_v43  ;;  %1996 = vmatpush1.bf16.msra.mxu0 %v4814_v44  ;;  %v4828_v4 = vld [vmem:[%s6924_s5 + $0x2ac] ss:$16 sps:$4 sm:$0xff]   ;;  %v4856_v35 = vld [vmem:[%s6924_s5 + $0x208] ss:$16 sps:$4 sm:$0xff]  }
 0x1d1   : > { %1944 = vmatprep.subr.bf16.mxu1 %v4819_v49  ;;  %1997 = vmatprep.subr.bf16.mxu0 %v4822_v50  ;;  %v4861_v36 = vld [vmem:[%s6924_s5 + $0x1ec] ss:$16 sps:$4 sm:$0xff]   ;;  %v4859_v38 = vld [vmem:[%s6924_s5 + $0x1e8] ss:$16 sps:$4 sm:$0xff]  }
 0x1d2   : > { %v1035_v5 = vmax.f32 %v967_v61, 0.0  ;;  %v1037_v6 = vmax.f32 %v1020_v62, 0.0  ;;  %v5884_v7 = vpack.c.bf16 %v1034_v59, %v1030_v53  ;;  %v5886_v8 = vpack.c.bf16 %v1036_v60, %v1032_v54  ;;  %v4864_v37 = vld [vmem:[%s6924_s5 + $0x3ec] ss:$16 sps:$4 sm:$0xff]   ;;  %v4865_v42 = vld [vmem:[%s6924_s5 + $0x1c8] ss:$16 sps:$4 sm:$0xff]  }
 0x1d3   : > { %v4870_v41 = vld [vmem:[%s6924_s5 + $0x3cc] ss:$16 sps:$4 sm:$0xff]   ;;  %v4868_v43 = vld [vmem:[%s6924_s5 + $0x3c8] ss:$16 sps:$4 sm:$0xff]  }
 0x1d4   : > { %v5888_v9 = vpack.c.bf16 %v1035_v5, %v1031_v55  ;;  %v5890_v10 = vpack.c.bf16 %v1037_v6, %v1033_v56  ;;  %1945 = vmatpush1.bf16.msra.mxu1 %v4817_v1  ;;  %1998 = vmatpush1.bf16.msra.mxu0 %v4820_v2  ;;  %v4873_v44 = vld [vmem:[%s6924_s5 + $0x1ac] ss:$16 sps:$4 sm:$0xff]   ;;  %v4871_v48 = vld [vmem:[%s6924_s5 + $0x1a8] ss:$16 sps:$4 sm:$0xff]  }
 0x1d5   : > { %1946 = vmatprep.subr.bf16.mxu1 %v4825_v3  ;;  %1999 = vmatprep.subr.bf16.mxu0 %v4828_v4  ;;  %v4876_v47 = vld [vmem:[%s6924_s5 + $0x3ac] ss:$16 sps:$4 sm:$0xff]   ;;  %v4874_v49 = vld [vmem:[%s6924_s5 + $0x3a8] ss:$16 sps:$4 sm:$0xff]  }
 0x1d6   : > { %1878 = vmatprep.mubr.bf16.mxu1 %v5888_v9  ;;  %1931 = vmatprep.mubr.bf16.mxu0 %v5890_v10  ;;  %v4879_v50 = vld [vmem:[%s6924_s5 + $0x18c] ss:$16 sps:$4 sm:$0xff]   ;;  %v4877_v52 = vld [vmem:[%s6924_s5 + $0x188] ss:$16 sps:$4 sm:$0xff]  }
 0x1d7   : > { %1879 = vmatmul.mubr.bf16.gmra.mxu1 %v5884_v7  ;;  %1932 = vmatmul.mubr.bf16.gmra.mxu0 %v5886_v8  ;;  %v4882_v51 = vld [vmem:[%s6924_s5 + $0x38c] ss:$16 sps:$4 sm:$0xff]   ;;  %v4880_v53 = vld [vmem:[%s6924_s5 + $0x388] ss:$16 sps:$4 sm:$0xff]  }
 0x1d8   : > { %1947 = vmatpush1.bf16.msra.mxu1 %v4823_v11  ;;  %2000 = vmatpush1.bf16.msra.mxu0 %v4826_v12  ;;  %v4885_v54 = vld [vmem:[%s6924_s5 + $0x16c] ss:$16 sps:$4 sm:$0xff]   ;;  %v4883_v56 = vld [vmem:[%s6924_s5 + $0x168] ss:$16 sps:$4 sm:$0xff]  }
 0x1d9   : > { %1974 = vmatprep.mubr.bf16.mxu1 %v1039_v39  ;;  %2027 = vmatprep.mubr.bf16.mxu0 %v1041_v40  ;;  %v4862_v39 = vld [vmem:[%s6924_s5 + $0x3e8] ss:$16 sps:$4 sm:$0xff]   ;;  %v4867_v40 = vld [vmem:[%s6924_s5 + $0x1cc] ss:$16 sps:$4 sm:$0xff]  }
 0x1da   : > { %1948 = vmatprep.subr.bf16.mxu1 %v4831_v13  ;;  %2001 = vmatprep.subr.bf16.mxu0 %v4834_v14  ;;  %v4888_v55 = vld [vmem:[%s6924_s5 + $0x36c] ss:$16 sps:$4 sm:$0xff]   ;;  %v4886_v57 = vld [vmem:[%s6924_s5 + $0x368] ss:$16 sps:$4 sm:$0xff]   ;;  %v4912_v14 = vld [vmem:[%s6926_s7 + $0x154] ss:$28 sps:$4 sm:$0xff]  }
 0x1db   : > { %v4891_v58 = vld [vmem:[%s6924_s5 + $0x14c] ss:$16 sps:$4 sm:$0xff]   ;;  %v4889_v60 = vld [vmem:[%s6924_s5 + $0x148] ss:$16 sps:$4 sm:$0xff]  }
 0x1dc   : > { %1949 = vmatpush1.bf16.msra.mxu1 %v4829_v15  ;;  %2002 = vmatpush1.bf16.msra.mxu0 %v4832_v16  ;;  %v4894_v59 = vld [vmem:[%s6924_s5 + $0x34c] ss:$16 sps:$4 sm:$0xff]   ;;  %v4892_v61 = vld [vmem:[%s6924_s5 + $0x348] ss:$16 sps:$4 sm:$0xff]  }
 0x1dd   : > { %1950 = vmatprep.subr.bf16.mxu1 %v4837_v17  ;;  %2003 = vmatprep.subr.bf16.mxu0 %v4840_v18  ;;  %v4897_v62 = vld [vmem:[%s6924_s5 + $0x12c] ss:$16 sps:$4 sm:$0xff]   ;;  %v4895_v2 = vld [vmem:[%s6924_s5 + $0x128] ss:$16 sps:$4 sm:$0xff]   ;;  %v4924_v18 = vld [vmem:[%s6926_s7 + $0x74] ss:$28 sps:$4 sm:$0xff]  }
 0x1de   : > { %v4900_v1 = vld [vmem:[%s6924_s5 + $0x32c] ss:$16 sps:$4 sm:$0xff]   ;;  %v4898_v3 = vld [vmem:[%s6924_s5 + $0x328] ss:$16 sps:$4 sm:$0xff]  }
 0x1df   : > { %v4903_v4 = vld [vmem:[%s6924_s5 + $0x10c] ss:$16 sps:$4 sm:$0xff]   ;;  %v4901_v6 = vld [vmem:[%s6924_s5 + $0x108] ss:$16 sps:$4 sm:$0xff]  }
 0x1e0   : > { %1951 = vmatpush1.bf16.msra.mxu1 %v4835_v19  ;;  %2004 = vmatpush1.bf16.msra.mxu0 %v4838_v20  ;;  %v4906_v5 = vld [vmem:[%s6924_s5 + $0x30c] ss:$16 sps:$4 sm:$0xff]   ;;  %v4904_v11 = vld [vmem:[%s6924_s5 + $0x308] ss:$16 sps:$4 sm:$0xff]   ;;  %v4963_v19 = vld [vmem:[%s6926_s7 + $0x4d4] ss:$28 sps:$4 sm:$0xff]  }
 0x1e1   : > { %1952 = vmatprep.subr.bf16.mxu1 %v4843_v21  ;;  %2005 = vmatprep.subr.bf16.mxu0 %v4846_v22  ;;  %v4909_v12 = vld [vmem:[%s6926_s7 + $0x18c] ss:$28 sps:$4 sm:$0xff]   ;;  %v4915_v16 = vld [vmem:[%s6926_s7 + $0x11c] ss:$28 sps:$4 sm:$0xff]  }
 0x1e2   : > { %v4907_v13 = vld [vmem:[%s6926_s7 + $0x188] ss:$28 sps:$4 sm:$0xff]   ;;  %v4910_v15 = vld [vmem:[%s6926_s7 + $0x150] ss:$28 sps:$4 sm:$0xff]   ;;  %v4927_v22 = vld [vmem:[%s6926_s7 + $0x3c] ss:$28 sps:$4 sm:$0xff]  }
 0x1e3   : > { %v4957_v17 = vld [vmem:[%s6926_s7 + $0x50c] ss:$28 sps:$4 sm:$0xff]  }
 0x1e4   : > { %1953 = vmatpush1.bf16.msra.mxu1 %v4841_v23  ;;  %2006 = vmatpush1.bf16.msra.mxu0 %v4844_v24  ;;  %v4922_v20 = vld [vmem:[%s6926_s7 + $0x70] ss:$28 sps:$4 sm:$0xff]   ;;  %v4967_v23 = vld [vmem:[%s6926_s7 + $0x498] ss:$28 sps:$4 sm:$0xff]  }
 0x1e5   : > { %1954 = vmatprep.subr.bf16.mxu1 %v4849_v25  ;;  %2007 = vmatprep.subr.bf16.mxu0 %v4852_v29  ;;  %v4961_v21 = vld [vmem:[%s6926_s7 + $0x4d0] ss:$28 sps:$4 sm:$0xff]   ;;  %v4969_v24 = vld [vmem:[%s6926_s7 + $0x49c] ss:$28 sps:$4 sm:$0xff]   ;;  %v4930_v29 = vld [vmem:[%s6926_s7 + $0x4] ss:$28 sps:$4 sm:$0xff]  }
 0x1e6   : > { %v4925_v25 = vld [vmem:[%s6926_s7 + $0x38] ss:$28 sps:$4 sm:$0xff]  }
 0x1e8   : > { %1955 = vmatpush1.bf16.msra.mxu1 %v4847_v30  ;;  %2008 = vmatpush1.bf16.msra.mxu0 %v4850_v31  ;;  %v4973_v30 = vld [vmem:[%s6926_s7 + $0x460] ss:$28 sps:$4 sm:$0xff]  }
 0x1e9   : > { %1956 = vmatprep.subr.bf16.mxu1 %v4855_v32  ;;  %2009 = vmatprep.subr.bf16.mxu0 %v4858_v33  ;;  %v4975_v31 = vld [vmem:[%s6926_s7 + $0x464] ss:$28 sps:$4 sm:$0xff]   ;;  %v4933_v33 = vld [vmem:[%s6926_s7 + $0x34c] ss:$28 sps:$4 sm:$0xff]  }
 0x1ea   : > { %v4928_v32 = vld [vmem:[%s6926_s7] ss:$28 sps:$4 sm:$0xff]  }
 0x1ec   : > { %1957 = vmatpush1.bf16.msra.mxu1 %v4853_v34  ;;  %2010 = vmatpush1.bf16.msra.mxu0 %v4856_v35  ;;  %v4979_v34 = vld [vmem:[%s6926_s7 + $0x428] ss:$28 sps:$4 sm:$0xff]  }
 0x1ed   : > { %1958 = vmatprep.subr.bf16.mxu1 %v4861_v36  ;;  %2011 = vmatprep.subr.bf16.mxu0 %v4864_v37  ;;  %v4981_v35 = vld [vmem:[%s6926_s7 + $0x42c] ss:$28 sps:$4 sm:$0xff]   ;;  %v4936_v37 = vld [vmem:[%s6926_s7 + $0x314] ss:$28 sps:$4 sm:$0xff]  }
 0x1ee   : > { %v4931_v36 = vld [vmem:[%s6926_s7 + $0x348] ss:$28 sps:$4 sm:$0xff]  }
 0x1f0   : > { %1959 = vmatpush2.bf16.msra.mxu1 %v4859_v38  ;;  %2012 = vmatpush2.bf16.msra.mxu0 %v4862_v39  ;;  %v4985_v38 = vld [vmem:[%s6926_s7 + $0x3f0] ss:$28 sps:$4 sm:$0xff]  }
 0x1f1   : > { %1960 = vmatprep.subr.bf16.mxu1 %v4867_v40  ;;  %2013 = vmatprep.subr.bf16.mxu0 %v4870_v41  ;;  %v4987_v39 = vld [vmem:[%s6926_s7 + $0x3f4] ss:$28 sps:$4 sm:$0xff]   ;;  %v4939_v41 = vld [vmem:[%s6926_s7 + $0x2dc] ss:$28 sps:$4 sm:$0xff]  }
 0x1f2   : > { %v4934_v40 = vld [vmem:[%s6926_s7 + $0x310] ss:$28 sps:$4 sm:$0xff]  }
 0x1f4   : > { %1961 = vmatpush2.bf16.msra.mxu1 %v4865_v42  ;;  %2014 = vmatpush2.bf16.msra.mxu0 %v4868_v43  ;;  %v4991_v42 = vld [vmem:[%s6926_s7 + $0x3b8] ss:$28 sps:$4 sm:$0xff]  }
 0x1f5   : > { %1962 = vmatprep.subr.bf16.mxu1 %v4873_v44  ;;  %2015 = vmatprep.subr.bf16.mxu0 %v4876_v47  ;;  %v4993_v43 = vld [vmem:[%s6926_s7 + $0x3bc] ss:$28 sps:$4 sm:$0xff]   ;;  %v4942_v47 = vld [vmem:[%s6926_s7 + $0x2a4] ss:$28 sps:$4 sm:$0xff]  }
 0x1f6   : > { %v4937_v44 = vld [vmem:[%s6926_s7 + $0x2d8] ss:$28 sps:$4 sm:$0xff]  }
 0x1f8   : > { %1963 = vmatpush2.bf16.msra.mxu1 %v4871_v48  ;;  %2016 = vmatpush2.bf16.msra.mxu0 %v4874_v49  ;;  %v4997_v48 = vld [vmem:[%s6926_s7 + $0x380] ss:$28 sps:$4 sm:$0xff]  }
 0x1f9   : > { %1964 = vmatprep.subr.bf16.mxu1 %v4879_v50  ;;  %2017 = vmatprep.subr.bf16.mxu0 %v4882_v51  ;;  %v4999_v49 = vld [vmem:[%s6926_s7 + $0x384] ss:$28 sps:$4 sm:$0xff]   ;;  %v4945_v51 = vld [vmem:[%s6926_s7 + $0x26c] ss:$28 sps:$4 sm:$0xff]  }
 0x1fa   : > { %v4940_v50 = vld [vmem:[%s6926_s7 + $0x2a0] ss:$28 sps:$4 sm:$0xff]  }
 0x1fc   : > { %1965 = vmatpush2.bf16.msra.mxu1 %v4877_v52  ;;  %2018 = vmatpush2.bf16.msra.mxu0 %v4880_v53  ;;  %v5003_v52 = vld [vmem:[%s6926_s7 + $0x6c8] ss:$28 sps:$4 sm:$0xff]  }
 0x1fd   : > { %1966 = vmatprep.subr.bf16.mxu1 %v4885_v54  ;;  %2019 = vmatprep.subr.bf16.mxu0 %v4888_v55  ;;  %v5005_v53 = vld [vmem:[%s6926_s7 + $0x6cc] ss:$28 sps:$4 sm:$0xff]   ;;  %v4948_v55 = vld [vmem:[%s6926_s7 + $0x234] ss:$28 sps:$4 sm:$0xff]  }
 0x1fe   : > { %v4943_v54 = vld [vmem:[%s6926_s7 + $0x268] ss:$28 sps:$4 sm:$0xff]  }
 0x200   : > { %1967 = vmatpush2.bf16.msra.mxu1 %v4883_v56  ;;  %2020 = vmatpush2.bf16.msra.mxu0 %v4886_v57  ;;  %v5009_v56 = vld [vmem:[%s6926_s7 + $0x690] ss:$28 sps:$4 sm:$0xff]  }
 0x201   : > { %1968 = vmatprep.subr.bf16.mxu1 %v4891_v58  ;;  %2021 = vmatprep.subr.bf16.mxu0 %v4894_v59  ;;  %v5011_v57 = vld [vmem:[%s6926_s7 + $0x694] ss:$28 sps:$4 sm:$0xff]   ;;  %v4951_v59 = vld [vmem:[%s6926_s7 + $0x1fc] ss:$28 sps:$4 sm:$0xff]  }
 0x202   : > { %v4946_v58 = vld [vmem:[%s6926_s7 + $0x230] ss:$28 sps:$4 sm:$0xff]  }
 0x204   : > { %1969 = vmatpush2.bf16.msra.mxu1 %v4889_v60  ;;  %2022 = vmatpush2.bf16.msra.mxu0 %v4892_v61  ;;  %v5015_v60 = vld [vmem:[%s6926_s7 + $0x658] ss:$28 sps:$4 sm:$0xff]  }
 0x205   : > { %1970 = vmatprep.subr.bf16.mxu1 %v4897_v62  ;;  %2023 = vmatprep.subr.bf16.mxu0 %v4900_v1  ;;  %v5017_v61 = vld [vmem:[%s6926_s7 + $0x65c] ss:$28 sps:$4 sm:$0xff]   ;;  %v4954_v1 = vld [vmem:[%s6926_s7 + $0x1c4] ss:$28 sps:$4 sm:$0xff]  }
 0x206   : > { %v4949_v62 = vld [vmem:[%s6926_s7 + $0x1f8] ss:$28 sps:$4 sm:$0xff]  }
 0x208   : > { %1971 = vmatpush2.bf16.msra.mxu1 %v4895_v2  ;;  %2024 = vmatpush2.bf16.msra.mxu0 %v4898_v3  ;;  %v5021_v2 = vld [vmem:[%s6926_s7 + $0x620] ss:$28 sps:$4 sm:$0xff]  }
 0x209   : > { %1972 = vmatprep.subr.bf16.mxu1 %v4903_v4  ;;  %2025 = vmatprep.subr.bf16.mxu0 %v4906_v5  ;;  %v5023_v3 = vld [vmem:[%s6926_s7 + $0x624] ss:$28 sps:$4 sm:$0xff]   ;;  %v4960_v5 = vld [vmem:[%s6926_s7 + $0x194] ss:$28 sps:$4 sm:$0xff]  }
 0x20a   : > { %v4952_v4 = vld [vmem:[%s6926_s7 + $0x1c0] ss:$28 sps:$4 sm:$0xff]  }
 0x20c   : > { %1973 = vmatpush2.bf16.msra.mxu1 %v4901_v6  ;;  %2026 = vmatpush2.bf16.msra.mxu0 %v4904_v11  ;;  %v5027_v6 = vld [vmem:[%s6926_s7 + $0x5e8] ss:$28 sps:$4 sm:$0xff]  }
 0x20d   : > { %3517 = vmatprep.subr.bf16.mxu1 %v4909_v12  ;;  %3570 = vmatprep.subr.bf16.mxu0 %v4957_v17  ;;  %v5029_v11 = vld [vmem:[%s6926_s7 + $0x5ec] ss:$28 sps:$4 sm:$0xff]   ;;  %v5035_v12 = vld [vmem:[%s6926_s7 + $0x5b4] ss:$28 sps:$4 sm:$0xff]  }
 0x20f   : > { %1975 = vmatmul.mubr.bf16.vlgmr.msra.gmra.mxu1 %v5860_v45  ;;  %2028 = vmatmul.mubr.bf16.vlgmr.msra.gmra.mxu0 %v5862_v46  ;;  %v4913_v45 = vld [vmem:[%s6926_s7 + $0x118] ss:$28 sps:$4 sm:$0xff]   ;;  %v4918_v46 = vld [vmem:[%s6926_s7 + $0xe4] ss:$28 sps:$4 sm:$0xff]  }
 0x210   : > { %1984 = vmatprep.mubr.bf16.mxu1 %v5888_v9  ;;  %2037 = vmatprep.mubr.bf16.mxu0 %v5890_v10  ;;  %v4916_v9 = vld [vmem:[%s6926_s7 + $0xe0] ss:$28 sps:$4 sm:$0xff]   ;;  %v4921_v10 = vld [vmem:[%s6926_s7 + $0xac] ss:$28 sps:$4 sm:$0xff]  }
 0x211   : > { %3518 = vmatpush1.bf16.msra.mxu1 %v4907_v13  ;;  %v5033_v13 = vld [vmem:[%s6926_s7 + $0x5b0] ss:$28 sps:$4 sm:$0xff]  }
 0x212   : > { %3519 = vmatprep.subr.bf16.mxu1 %v4912_v14  ;;  %v5041_v14 = vld [vmem:[%s6926_s7 + $0x57c] ss:$28 sps:$4 sm:$0xff]  }
 0x215   : > { %3520 = vmatpush1.bf16.msra.mxu1 %v4910_v15  ;;  %v5039_v15 = vld [vmem:[%s6926_s7 + $0x578] ss:$28 sps:$4 sm:$0xff]  }
 0x216   : > { %3521 = vmatprep.subr.bf16.mxu1 %v4915_v16  ;;  %v5047_v16 = vld [vmem:[%s6926_s7 + $0x544] ss:$28 sps:$4 sm:$0xff]  }
 0x217   : > { %1985 = vmatmul.mubr.bf16.gmra.mxu1 %v5884_v7  ;;  %2038 = vmatmul.mubr.bf16.gmra.mxu0 %v5886_v8  ;;  %v4919_v7 = vld [vmem:[%s6926_s7 + $0xa8] ss:$28 sps:$4 sm:$0xff]  }
 0x218   : > { %v4955_v8 = vld [vmem:[%s6926_s7 + $0x508] ss:$28 sps:$4 sm:$0xff]  }
 0x219   : > { %3522 = vmatpush1.bf16.msra.mxu1 %v4913_v45  ;;  %3571 = vmatpush1.bf16.msra.mxu0 %v4955_v8  ;;  %v5045_v45 = vld [vmem:[%s6926_s7 + $0x540] ss:$28 sps:$4 sm:$0xff]  }
 0x21a   : > { %3523 = vmatprep.subr.bf16.mxu1 %v4918_v46  ;;  %3572 = vmatprep.subr.bf16.mxu0 %v4963_v19  ;;  %v5053_v46 = vld [vmem:[%s6926_s7 + $0x514] ss:$28 sps:$4 sm:$0xff]  }
 0x21d   : > { %3524 = vmatpush1.bf16.msra.mxu1 %v4916_v9  ;;  %3573 = vmatpush1.bf16.msra.mxu0 %v4961_v21  ;;  %v6265_v9 = vld [vmem:[%s6925_s6] sm:$0xf] }
 0x21e   : > { %3525 = vmatprep.subr.bf16.mxu1 %v4921_v10  ;;  %3574 = vmatprep.subr.bf16.mxu0 %v4969_v24  ;;  %v1183_v10 = vrot.slane %v6265_v9, %v5639_v27  ;;  %v1179_v17 = vrot.slane %v6265_v9, %v5642_v28 }
 0x221   : > { %3526 = vmatpush1.bf16.msra.mxu1 %v4919_v7  ;;  %3575 = vmatpush1.bf16.msra.mxu0 %v4967_v23 }
 0x222   : > { %3527 = vmatprep.subr.bf16.mxu1 %v4924_v18  ;;  %3576 = vmatprep.subr.bf16.mxu0 %v4975_v31 }
 0x225   : > { %3528 = vmatpush1.bf16.msra.mxu1 %v4922_v20  ;;  %3577 = vmatpush1.bf16.msra.mxu0 %v4973_v30 }
 0x226   : > { %3529 = vmatprep.subr.bf16.mxu1 %v4927_v22  ;;  %3578 = vmatprep.subr.bf16.mxu0 %v4981_v35 }
 0x229   : > { %3530 = vmatpush1.bf16.msra.mxu1 %v4925_v25  ;;  %3579 = vmatpush1.bf16.msra.mxu0 %v4979_v34 }
 0x22a   : > { %3531 = vmatprep.subr.bf16.mxu1 %v4930_v29  ;;  %3580 = vmatprep.subr.bf16.mxu0 %v4987_v39 }
 0x22d   : > { %3532 = vmatpush1.bf16.msra.mxu1 %v4928_v32  ;;  %3581 = vmatpush1.bf16.msra.mxu0 %v4985_v38 }
 0x22e   : > { %3533 = vmatprep.subr.bf16.mxu1 %v4933_v33  ;;  %3582 = vmatprep.subr.bf16.mxu0 %v4993_v43 }
 0x231   : > { %3534 = vmatpush2.bf16.msra.mxu1 %v4931_v36  ;;  %3583 = vmatpush1.bf16.msra.mxu0 %v4991_v42 }
 0x232   : > { %3535 = vmatprep.subr.bf16.mxu1 %v4936_v37  ;;  %3584 = vmatprep.subr.bf16.mxu0 %v4999_v49 }
 0x235   : > { %3536 = vmatpush2.bf16.msra.mxu1 %v4934_v40  ;;  %3585 = vmatpush1.bf16.msra.mxu0 %v4997_v48 }
 0x236   : > { %3537 = vmatprep.subr.bf16.mxu1 %v4939_v41  ;;  %3586 = vmatprep.subr.bf16.mxu0 %v5005_v53  ;;  %v4958_v53 = vld [vmem:[%s6926_s7 + $0x190] ss:$28 sps:$4 sm:$0xff]  }
 0x239   : > { %3538 = vmatpush2.bf16.msra.mxu1 %v4937_v44  ;;  %3587 = vmatpush2.bf16.msra.mxu0 %v5003_v52 }
 0x23a   : > { %3539 = vmatprep.subr.bf16.mxu1 %v4942_v47  ;;  %3588 = vmatprep.subr.bf16.mxu0 %v5011_v57  ;;  %v4966_v57 = vld [vmem:[%s6926_s7 + $0x15c] ss:$28 sps:$4 sm:$0xff]  }
 0x23d   : > { %3540 = vmatpush2.bf16.msra.mxu1 %v4940_v50  ;;  %3589 = vmatpush2.bf16.msra.mxu0 %v5009_v56 }
 0x23e   : > { %3541 = vmatprep.subr.bf16.mxu1 %v4945_v51  ;;  %3590 = vmatprep.subr.bf16.mxu0 %v5017_v61 }
 0x241   : > { %3542 = vmatpush2.bf16.msra.mxu1 %v4943_v54  ;;  %3591 = vmatpush2.bf16.msra.mxu0 %v5015_v60 }
 0x242   : > { %3543 = vmatprep.subr.bf16.mxu1 %v4948_v55  ;;  %3592 = vmatprep.subr.bf16.mxu0 %v5023_v3  ;;  %v4972_v3 = vld [vmem:[%s6926_s7 + $0x124] ss:$28 sps:$4 sm:$0xff]  }
 0x245   : > { %3544 = vmatpush2.bf16.msra.mxu1 %v4946_v58  ;;  %3593 = vmatpush2.bf16.msra.mxu0 %v5021_v2  ;;  %v4964_v2 = vld [vmem:[%s6926_s7 + $0x158] ss:$28 sps:$4 sm:$0xff]  }
 0x246   : > { %3545 = vmatprep.subr.bf16.mxu1 %v4951_v59  ;;  %3594 = vmatprep.subr.bf16.mxu0 %v5029_v11  ;;  %v4970_v11 = vld [vmem:[%s6926_s7 + $0x120] ss:$28 sps:$4 sm:$0xff]  }
 0x249   : > { %3546 = vmatpush2.bf16.msra.mxu1 %v4949_v62  ;;  %3595 = vmatpush2.bf16.msra.mxu0 %v5027_v6 }
 0x24a   : > { %3547 = vmatprep.subr.bf16.mxu1 %v4954_v1  ;;  %3596 = vmatprep.subr.bf16.mxu0 %v5035_v12  ;;  %v4978_v12 = vld [vmem:[%s6926_s7 + $0xec] ss:$28 sps:$4 sm:$0xff]  }
 0x24d   : > { %3548 = vmatpush2.bf16.msra.mxu1 %v4952_v4  ;;  %3597 = vmatpush2.bf16.msra.mxu0 %v5033_v13  ;;  %v4976_v13 = vld [vmem:[%s6926_s7 + $0xe8] ss:$28 sps:$4 sm:$0xff]  }
 0x24e   : > { %3623 = vmatprep.subr.bf16.mxu1 %v4960_v5  ;;  %3598 = vmatprep.subr.bf16.mxu0 %v5041_v14  ;;  %v4984_v14 = vld [vmem:[%s6926_s7 + $0xb4] ss:$28 sps:$4 sm:$0xff]  }
 0x251   : > { %3599 = vmatpush2.bf16.msra.mxu0 %v5039_v15  ;;  %v4982_v15 = vld [vmem:[%s6926_s7 + $0xb0] ss:$28 sps:$4 sm:$0xff]  }
 0x252   : > { %3600 = vmatprep.subr.bf16.mxu0 %v5047_v16  ;;  %v4990_v16 = vld [vmem:[%s6926_s7 + $0x7c] ss:$28 sps:$4 sm:$0xff]  }
 0x255   : > { %3601 = vmatpush2.bf16.msra.mxu0 %v5045_v45  ;;  %v4988_v45 = vld [vmem:[%s6926_s7 + $0x78] ss:$28 sps:$4 sm:$0xff]  }
 0x256   : > { %3676 = vmatprep.subr.bf16.mxu0 %v5053_v46  ;;  %v4996_v46 = vld [vmem:[%s6926_s7 + $0x44] ss:$28 sps:$4 sm:$0xff]  }
 0x28f   : > { %v1870_v7 = vpop.f32.mrf.mxu1  ;;  %v1923_v8 = vpop.f32.mrf.mxu0 }
 0x290   : > { %v1871_v21 = vadd.f32 %v1870_v7, %v1179_v17  ;;  %v5000_v7 = vld [vmem:[%s6926_s7 + $0x8] ss:$28 sps:$4 sm:$0xff]  }
 0x291   : > { %v1872_v18 = vpop.f32.mrf.mxu1  ;;  %v1925_v19 = vpop.f32.mrf.mxu0 }
 0x292   : > { %v1873_v20 = vadd.f32 %v1872_v18, %v1183_v10  ;;  %v1924_v33 = vadd.f32 %v1923_v8, %v1871_v21  ;;  %v5008_v8 = vld [vmem:[%s6926_s7 + $0x354] ss:$28 sps:$4 sm:$0xff]   ;;  %v5020_v21 = vld [vmem:[%s6926_s7 + $0x2e4] ss:$28 sps:$4 sm:$0xff]  }
 0x293   : > { %v1874_v22 = vpop.f32.mrf.mxu1  ;;  %v1927_v23 = vpop.f32.mrf.mxu0  ;;  %v5006_v18 = vld [vmem:[%s6926_s7 + $0x350] ss:$28 sps:$4 sm:$0xff]  }
 0x294   : > { %v1875_v24 = vadd.f32 %v1874_v22, %v1179_v17  ;;  %v1926_v30 = vadd.f32 %v1925_v19, %v1873_v20  ;;  %v2048_v44 = vmax.f32 %v1924_v33, 0.0  ;;  %v5014_v19 = vld [vmem:[%s6926_s7 + $0x31c] ss:$28 sps:$4 sm:$0xff]  }
 0x295   : > { %v1876_v25 = vpop.f32.mrf.mxu1  ;;  %v1929_v29 = vpop.f32.mrf.mxu0  ;;  %v5012_v20 = vld [vmem:[%s6926_s7 + $0x318] ss:$28 sps:$4 sm:$0xff]   ;;  %v5018_v22 = vld [vmem:[%s6926_s7 + $0x2e0] ss:$28 sps:$4 sm:$0xff]  }
 0x296   : > { %v1928_v31 = vadd.f32 %v1927_v23, %v1875_v24  ;;  %v1877_v32 = vadd.f32 %v1876_v25, %v1183_v10  ;;  %v2049_v41 = vmax.f32 %v1926_v30, 0.0  ;;  %v5026_v23 = vld [vmem:[%s6926_s7 + $0x2ac] ss:$28 sps:$4 sm:$0xff]   ;;  %v5032_v25 = vld [vmem:[%s6926_s7 + $0x274] ss:$28 sps:$4 sm:$0xff]  }
 0x297   : > { %v1880_v34 = vpop.f32.mrf.mxu1  ;;  %v1933_v35 = vpop.f32.mrf.mxu0  ;;  %v5024_v24 = vld [vmem:[%s6926_s7 + $0x2a8] ss:$28 sps:$4 sm:$0xff]   ;;  %v5038_v30 = vld [vmem:[%s6926_s7 + $0x23c] ss:$28 sps:$4 sm:$0xff]  }
 0x298   : > { %v1930_v36 = vadd.f32 %v1929_v29, %v1877_v32  ;;  %v1881_v37 = vadd.f32 %v1880_v34, %v1179_v17  ;;  %v2052_v38 = vmax.f32 %v1928_v31, 0.0  ;;  %v5030_v29 = vld [vmem:[%s6926_s7 + $0x270] ss:$28 sps:$4 sm:$0xff]   ;;  %v1191_v31 = vrot.slane %v6265_v9, %v5842_v63 }
 0x299   : > { %v1882_v39 = vpop.f32.mrf.mxu1  ;;  %v1935_v40 = vpop.f32.mrf.mxu0  ;;  %v1187_v32 = vrot.slane %v6265_v9, %v5845_v0  ;;  %v5042_v9 = vld [vmem:[%s6926_s7 + $0x200] ss:$28 sps:$4 sm:$0xff]  }
 0x29a   : > { %v2053_v42 = vmax.f32 %v1930_v36, 0.0  ;;  %v1883_v43 = vadd.f32 %v1882_v39, %v1183_v10  ;;  %v1934_v47 = vadd.f32 %v1933_v35, %v1881_v37  ;;  %v6276_v54 = vpack.c.bf16 %v2052_v38, %v2048_v44  ;;  %v5036_v35 = vld [vmem:[%s6926_s7 + $0x238] ss:$28 sps:$4 sm:$0xff]   ;;  %v5044_v38 = vld [vmem:[%s6926_s7 + $0x204] ss:$28 sps:$4 sm:$0xff]  }
 0x29b   : > { %v1884_v48 = vpop.f32.mrf.mxu1  ;;  %v1937_v49 = vpop.f32.mrf.mxu0 }
 0x29c   : > { %v6271_v50 = vpack.c.bf16 %v2053_v42, %v2049_v41  ;;  %v1885_v51 = vadd.f32 %v1884_v48, %v1179_v17  ;;  %v1936_v52 = vadd.f32 %v1935_v40, %v1883_v43  ;;  %v2056_v60 = vmax.f32 %v1934_v47, 0.0  ;;  %v5002_v17 = vld [vmem:[%s6926_s7 + $0xc] ss:$28 sps:$4 sm:$0xff]  }
 0x29d   : > { %v1886_v55 = vpop.f32.mrf.mxu1  ;;  %v1939_v56 = vpop.f32.mrf.mxu0  ;;  %v5050_v48 = vld [vmem:[%s6926_s7 + $0x1cc] ss:$28 sps:$4 sm:$0xff]  }
 0x29e   : > { %v1887_v58 = vadd.f32 %v1886_v55, %v1183_v10  ;;  %v1938_v59 = vadd.f32 %v1937_v49, %v1885_v51  ;;  %3549 = vmatprep.mubr.bf16.mxu1 %v6271_v50  ;;  %v2057_v61 = vmax.f32 %v1936_v52, 0.0  ;;  %v4994_v10 = vld [vmem:[%s6926_s7 + $0x40] ss:$28 sps:$4 sm:$0xff]  }
 0x29f   : > { %3550 = vmatmul.mubr.bf16.vlgmr.msra.gmra.mxu1 %v6276_v54 }
 0x2a0   : > { %v2060_v62 = vmax.f32 %v1938_v59, 0.0  ;;  %v1940_v1 = vadd.f32 %v1939_v56, %v1887_v58  ;;  %3624 = vmatpush1.bf16.msra.mxu1 %v4958_v53  ;;  %v5048_v58 = vld [vmem:[%s6926_s7 + $0x1c8] ss:$28 sps:$4 sm:$0xff]  }
 0x2a1   : > { %3625 = vmatprep.subr.bf16.mxu1 %v4966_v57 }
 0x2a2   : > { %v2061_v4 = vmax.f32 %v1940_v1, 0.0  ;;  %v6289_v5 = vpack.c.bf16 %v2060_v62, %v2056_v60  ;;  %v5056_v62 = vld [vmem:[%s6926_s7 + $0x19c] ss:$28 sps:$4 sm:$0xff]  }
 0x2a4   : > { %v6291_v6 = vpack.c.bf16 %v2061_v4, %v2057_v61  ;;  %3626 = vmatpush1.bf16.msra.mxu1 %v4964_v2 }
 0x2a5   : > { %3627 = vmatprep.subr.bf16.mxu1 %v4972_v3 }
 0x2a6   : > { %3559 = vmatprep.mubr.bf16.mxu1 %v6291_v6 }
 0x2a7   : > { %3560 = vmatmul.mubr.bf16.gmra.mxu1 %v6289_v5 }
 0x2a8   : > { %3628 = vmatpush1.bf16.msra.mxu1 %v4970_v11  ;;  %3655 = vmatprep.mubr.bf16.mxu1 %v6271_v50 }
 0x2a9   : > { %3629 = vmatprep.subr.bf16.mxu1 %v4978_v12 }
 0x2ac   : > { %3630 = vmatpush1.bf16.msra.mxu1 %v4976_v13 }
 0x2ad   : > { %3631 = vmatprep.subr.bf16.mxu1 %v4984_v14 }
 0x2b0   : > { %3632 = vmatpush1.bf16.msra.mxu1 %v4982_v15 }
 0x2b1   : > { %3633 = vmatprep.subr.bf16.mxu1 %v4990_v16  ;;  %v5051_v16 = vld [vmem:[%s6926_s7 + $0x510] ss:$28 sps:$4 sm:$0xff]  }
 0x2b4   : > { %3634 = vmatpush1.bf16.msra.mxu1 %v4988_v45 }
 0x2b5   : > { %3635 = vmatprep.subr.bf16.mxu1 %v4996_v46 }
 0x2b8   : > { %3636 = vmatpush1.bf16.msra.mxu1 %v4994_v10  ;;  %v5054_v10 = vld [vmem:[%s6926_s7 + $0x198] ss:$28 sps:$4 sm:$0xff]  }
 0x2b9   : > { %3637 = vmatprep.subr.bf16.mxu1 %v5002_v17  ;;  %v5059_v17 = vld [vmem:[%s6926_s7 + $0x4dc] ss:$28 sps:$4 sm:$0xff]  }
 0x2bc   : > { %3638 = vmatpush1.bf16.msra.mxu1 %v5000_v7 }
 0x2bd   : > { %3639 = vmatprep.subr.bf16.mxu1 %v5008_v8 }
 0x2c0   : > { %3640 = vmatpush2.bf16.msra.mxu1 %v5006_v18 }
 0x2c1   : > { %3641 = vmatprep.subr.bf16.mxu1 %v5014_v19  ;;  %v5062_v19 = vld [vmem:[%s6926_s7 + $0x164] ss:$28 sps:$4 sm:$0xff]  }
 0x2c4   : > { %3642 = vmatpush2.bf16.msra.mxu1 %v5012_v20 }
 0x2c5   : > { %3643 = vmatprep.subr.bf16.mxu1 %v5020_v21 }
 0x2c8   : > { %3644 = vmatpush2.bf16.msra.mxu1 %v5018_v22 }
 0x2c9   : > { %3645 = vmatprep.subr.bf16.mxu1 %v5026_v23  ;;  %v5057_v23 = vld [vmem:[%s6926_s7 + $0x4d8] ss:$28 sps:$4 sm:$0xff]  }
 0x2cc   : > { %3646 = vmatpush2.bf16.msra.mxu1 %v5024_v24 }
 0x2cd   : > { %3647 = vmatprep.subr.bf16.mxu1 %v5032_v25  ;;  %v5060_v25 = vld [vmem:[%s6926_s7 + $0x160] ss:$28 sps:$4 sm:$0xff]  }
 0x2cf   : > { %v1976_v33 = vpop.f32.mrf.mxu1  ;;  %v2029_v34 = vpop.f32.mrf.mxu0 }
 0x2d0   : > { %3648 = vmatpush2.bf16.msra.mxu1 %v5030_v29  ;;  %v1977_v40 = vadd.f32 %v1976_v33, %v1187_v32  ;;  %v5065_v29 = vld [vmem:[%s6926_s7 + $0x4a4] ss:$28 sps:$4 sm:$0xff]  }
 0x2d1   : > { %v1978_v36 = vpop.f32.mrf.mxu1  ;;  %v2031_v37 = vpop.f32.mrf.mxu0  ;;  %3649 = vmatprep.subr.bf16.mxu1 %v5038_v30 }
 0x2d2   : > { %v1979_v39 = vadd.f32 %v1978_v36, %v1191_v31  ;;  %v2030_v53 = vadd.f32 %v2029_v34, %v1977_v40  ;;  %v5069_v40 = vld [vmem:[%s6926_s7 + $0x468] ss:$28 sps:$4 sm:$0xff]  }
 0x2d3   : > { %v1980_v41 = vpop.f32.mrf.mxu1  ;;  %v2033_v42 = vpop.f32.mrf.mxu0 }
 0x2d4   : > { %v1981_v43 = vadd.f32 %v1980_v41, %v1187_v32  ;;  %3650 = vmatpush2.bf16.msra.mxu1 %v5036_v35  ;;  %v2032_v49 = vadd.f32 %v2031_v37, %v1979_v39  ;;  %v2050_v4 = vmax.f32 %v2030_v53, 0.0  ;;  %v5063_v35 = vld [vmem:[%s6926_s7 + $0x4a0] ss:$28 sps:$4 sm:$0xff]   ;;  %v5066_v37 = vld [vmem:[%s6926_s7 + $0x128] ss:$28 sps:$4 sm:$0xff]  }
 0x2d5   : > { %v1982_v44 = vpop.f32.mrf.mxu1  ;;  %v2035_v47 = vpop.f32.mrf.mxu0  ;;  %3651 = vmatprep.subr.bf16.mxu1 %v5044_v38  ;;  %v5071_v38 = vld [vmem:[%s6926_s7 + $0x46c] ss:$28 sps:$4 sm:$0xff]   ;;  %v5074_v39 = vld [vmem:[%s6926_s7 + $0xf4] ss:$28 sps:$4 sm:$0xff]  }
 0x2d6   : > { %v2034_v51 = vadd.f32 %v2033_v42, %v1981_v43  ;;  %v1983_v52 = vadd.f32 %v1982_v44, %v1191_v31  ;;  %v2051_v1 = vmax.f32 %v2032_v49, 0.0  ;;  %v5072_v41 = vld [vmem:[%s6926_s7 + $0xf0] ss:$28 sps:$4 sm:$0xff]   ;;  %v5080_v43 = vld [vmem:[%s6926_s7 + $0xbc] ss:$28 sps:$4 sm:$0xff]  }
 0x2d7   : > { %v1986_v55 = vpop.f32.mrf.mxu1  ;;  %v2039_v56 = vpop.f32.mrf.mxu0  ;;  %v5077_v42 = vld [vmem:[%s6926_s7 + $0x434] ss:$28 sps:$4 sm:$0xff]   ;;  %v5092_v53 = vld [vmem:[%s6926_s7 + $0x4c] ss:$28 sps:$4 sm:$0xff]  }
 0x2d8   : > { %v2036_v57 = vadd.f32 %v2035_v47, %v1983_v52  ;;  %3652 = vmatpush2.bf16.msra.mxu1 %v5042_v9  ;;  %v2054_v59 = vmax.f32 %v2034_v51, 0.0  ;;  %v1987_v11 = vadd.f32 %v1986_v55, %v1187_v32  ;;  %v5075_v9 = vld [vmem:[%s6926_s7 + $0x430] ss:$28 sps:$4 sm:$0xff]   ;;  %v5078_v44 = vld [vmem:[%s6926_s7 + $0xb8] ss:$28 sps:$4 sm:$0xff]  }
 0x2d9   : > { %v1988_v60 = vpop.f32.mrf.mxu1  ;;  %v2041_v61 = vpop.f32.mrf.mxu0  ;;  %3653 = vmatprep.subr.bf16.mxu1 %v5050_v48  ;;  %v5083_v47 = vld [vmem:[%s6926_s7 + $0x3fc] ss:$28 sps:$4 sm:$0xff]   ;;  %v5086_v48 = vld [vmem:[%s6926_s7 + $0x84] ss:$28 sps:$4 sm:$0xff]  }
 0x2da   : > { %v2055_v2 = vmax.f32 %v2036_v57, 0.0  ;;  %v1989_v3 = vadd.f32 %v1988_v60, %v1191_v31  ;;  %v6389_v45 = vpack.c.bf16 %v2054_v59, %v2050_v4  ;;  %v2040_v20 = vadd.f32 %v2039_v56, %v1987_v11  ;;  %v5081_v49 = vld [vmem:[%s6926_s7 + $0x3f8] ss:$28 sps:$4 sm:$0xff]   ;;  %v5084_v51 = vld [vmem:[%s6926_s7 + $0x80] ss:$28 sps:$4 sm:$0xff]  }
 0x2db   : > { %v1990_v12 = vpop.f32.mrf.mxu1  ;;  %v2043_v13 = vpop.f32.mrf.mxu0  ;;  %v5089_v52 = vld [vmem:[%s6926_s7 + $0x3c4] ss:$28 sps:$4 sm:$0xff]   ;;  %v5095_v57 = vld [vmem:[%s6926_s7 + $0x38c] ss:$28 sps:$4 sm:$0xff]   ;;  %v5105_v11 = vld [vmem:[%s6926_s7 + $0x698] ss:$28 sps:$4 sm:$0xff]  }
 0x2dc   : > { %v6384_v14 = vpack.c.bf16 %v2055_v2, %v2051_v1  ;;  %v1991_v15 = vadd.f32 %v1990_v12, %v1187_v32  ;;  %3654 = vmatpush2.bf16.msra.mxu1 %v5048_v58  ;;  %v2042_v7 = vadd.f32 %v2041_v61, %v1989_v3  ;;  %v5068_v32 = vld [vmem:[%s6926_s7 + $0x12c] ss:$28 sps:$4 sm:$0xff]   ;;  %v2058_v33 = vmax.f32 %v2040_v20, 0.0  ;;  %v5087_v55 = vld [vmem:[%s6926_s7 + $0x3c0] ss:$28 sps:$4 sm:$0xff]  }
 0x2dd   : > { %v1992_v46 = vpop.f32.mrf.mxu1  ;;  %3729 = vmatprep.subr.bf16.mxu1 %v5056_v62  ;;  %v2045_v21 = vpop.f32.mrf.mxu0  ;;  %v5090_v56 = vld [vmem:[%s6926_s7 + $0x48] ss:$28 sps:$4 sm:$0xff]   ;;  %v5098_v58 = vld [vmem:[%s6926_s7 + $0x14] ss:$28 sps:$4 sm:$0xff]   ;;  %v5104_v62 = vld [vmem:[%s6926_s7 + $0x35c] ss:$28 sps:$4 sm:$0xff]  }
 0x2de   : > { %v2044_v8 = vadd.f32 %v2043_v13, %v1991_v15  ;;  %v1993_v18 = vadd.f32 %v1992_v46, %v1191_v31  ;;  %3602 = vmatprep.mubr.bf16.mxu0 %v6384_v14  ;;  %v2059_v30 = vmax.f32 %v2042_v7, 0.0  ;;  %v5093_v59 = vld [vmem:[%s6926_s7 + $0x388] ss:$28 sps:$4 sm:$0xff]   ;;  %v5096_v60 = vld [vmem:[%s6926_s7 + $0x10] ss:$28 sps:$4 sm:$0xff]  }
 0x2df   : > { %3603 = vmatmul.mubr.bf16.vlgmr.msra.gmra.mxu0 %v6389_v45  ;;  %3656 = vmatmul.mubr.bf16.vlgmr.msra.gmra.mxu1 %v6276_v54  ;;  %v5101_v61 = vld [vmem:[%s6926_s7 + $0x6d4] ss:$28 sps:$4 sm:$0xff]   ;;  %v5107_v3 = vld [vmem:[%s6926_s7 + $0x69c] ss:$28 sps:$4 sm:$0xff]   ;;  %v5110_v4 = vld [vmem:[%s6926_s7 + $0x324] ss:$28 sps:$4 sm:$0xff]  }
 0x2e0   : > { %v2046_v22 = vadd.f32 %v2045_v21, %v1993_v18  ;;  %3677 = vmatpush1.bf16.msra.mxu0 %v5051_v16  ;;  %3665 = vmatprep.mubr.bf16.mxu1 %v6291_v6  ;;  %v2062_v24 = vmax.f32 %v2044_v8, 0.0  ;;  %v5099_v1 = vld [vmem:[%s6926_s7 + $0x6d0] ss:$28 sps:$4 sm:$0xff]   ;;  %v5102_v2 = vld [vmem:[%s6926_s7 + $0x358] ss:$28 sps:$4 sm:$0xff]  }
 0x2e1   : > { %3730 = vmatpush1.bf16.msra.mxu1 %v5054_v10  ;;  %3678 = vmatprep.subr.bf16.mxu0 %v5059_v17  ;;  %v5108_v12 = vld [vmem:[%s6926_s7 + $0x320] ss:$28 sps:$4 sm:$0xff]   ;;  %v5116_v15 = vld [vmem:[%s6926_s7 + $0x2ec] ss:$28 sps:$4 sm:$0xff]   ;;  %v5122_v17 = vld [vmem:[%s6926_s7 + $0x2b4] ss:$28 sps:$4 sm:$0xff]  }
 0x2e2   : > { %v2063_v31 = vmax.f32 %v2046_v22, 0.0  ;;  %3731 = vmatprep.subr.bf16.mxu1 %v5062_v19  ;;  %v6421_v36 = vpack.c.bf16 %v2062_v24, %v2058_v33  ;;  %v5113_v13 = vld [vmem:[%s6926_s7 + $0x664] ss:$28 sps:$4 sm:$0xff]   ;;  %v5119_v10 = vld [vmem:[%s6926_s7 + $0x62c] ss:$28 sps:$4 sm:$0xff]  }
 0x2e3   : > { %v5111_v16 = vld [vmem:[%s6926_s7 + $0x660] ss:$28 sps:$4 sm:$0xff]   ;;  %v5114_v46 = vld [vmem:[%s6926_s7 + $0x2e8] ss:$28 sps:$4 sm:$0xff]   ;;  %v5120_v8 = vld [vmem:[%s6926_s7 + $0x2b0] ss:$28 sps:$4 sm:$0xff]  }
 0x2e4   : > { %v6416_v34 = vpack.c.bf16 %v2063_v31, %v2059_v30  ;;  %3679 = vmatpush1.bf16.msra.mxu0 %v5057_v23  ;;  %v5117_v7 = vld [vmem:[%s6926_s7 + $0x628] ss:$28 sps:$4 sm:$0xff]   ;;  %v5125_v18 = vld [vmem:[%s6926_s7 + $0x5f4] ss:$28 sps:$4 sm:$0xff]   ;;  %v5128_v19 = vld [vmem:[%s6926_s7 + $0x27c] ss:$28 sps:$4 sm:$0xff]  }
 0x2e5   : > { %3732 = vmatpush1.bf16.msra.mxu1 %v5060_v25  ;;  %3680 = vmatprep.subr.bf16.mxu0 %v5065_v29  ;;  %v5123_v20 = vld [vmem:[%s6926_s7 + $0x5f0] ss:$28 sps:$4 sm:$0xff]   ;;  %v5126_v21 = vld [vmem:[%s6926_s7 + $0x278] ss:$28 sps:$4 sm:$0xff]   ;;  %v5134_v23 = vld [vmem:[%s6926_s7 + $0x244] ss:$28 sps:$4 sm:$0xff]  }
 0x2e6   : > { %3612 = vmatprep.mubr.bf16.mxu0 %v6416_v34  ;;  %3733 = vmatprep.subr.bf16.mxu1 %v5068_v32  ;;  %v5131_v22 = vld [vmem:[%s6926_s7 + $0x5bc] ss:$28 sps:$4 sm:$0xff]   ;;  %v5137_v29 = vld [vmem:[%s6926_s7 + $0x584] ss:$28 sps:$4 sm:$0xff]   ;;  %v5140_v30 = vld [vmem:[%s6926_s7 + $0x20c] ss:$28 sps:$4 sm:$0xff]  }
 0x2e7   : > { %3613 = vmatmul.mubr.bf16.gmra.mxu0 %v6421_v36  ;;  %3666 = vmatmul.mubr.bf16.gmra.mxu1 %v6289_v5  ;;  %v5129_v24 = vld [vmem:[%s6926_s7 + $0x5b8] ss:$28 sps:$4 sm:$0xff]   ;;  %v5132_v25 = vld [vmem:[%s6926_s7 + $0x240] ss:$28 sps:$4 sm:$0xff]   ;;  %v5138_v32 = vld [vmem:[%s6926_s7 + $0x208] ss:$28 sps:$4 sm:$0xff]  }
 0x2e8   : > { %3681 = vmatpush1.bf16.msra.mxu0 %v5063_v35  ;;  %3708 = vmatprep.mubr.bf16.mxu0 %v6384_v14  ;;  %v5135_v31 = vld [vmem:[%s6926_s7 + $0x580] ss:$28 sps:$4 sm:$0xff]   ;;  %v5143_v33 = vld [vmem:[%s6926_s7 + $0x54c] ss:$28 sps:$4 sm:$0xff]   ;;  %v5146_v35 = vld [vmem:[%s6926_s7 + $0x1d4] ss:$28 sps:$4 sm:$0xff]  }
 0x2e9   : > { %3734 = vmatpush1.bf16.msra.mxu1 %v5066_v37  ;;  %3761 = vmatprep.mubr.bf16.mxu1 %v6271_v50  ;;  %v5141_v37 = vld [vmem:[%s6926_s7 + $0x548] ss:$28 sps:$4 sm:$0xff]  }
 0x2ea   : > { %3682 = vmatprep.subr.bf16.mxu0 %v5071_v38  ;;  %3735 = vmatprep.subr.bf16.mxu1 %v5074_v39  ;;  %v5144_v38 = vld [vmem:[%s6926_s7 + $0x1d0] ss:$28 sps:$4 sm:$0xff]   ;;  %v5149_v39 = vld [vmem:[%s6926_s7 + $0x51c] ss:$28 sps:$4 sm:$0xff]  }
 0x2ec   : > { %3683 = vmatpush1.bf16.msra.mxu0 %v5069_v40  ;;  %v5150_v40 = vld [vmem:[%s6926_s7 + $0x360] ss:$28 sps:$4 sm:$0xff]  }
 0x2ed   : > { %3736 = vmatpush1.bf16.msra.mxu1 %v5072_v41  ;;  %3684 = vmatprep.subr.bf16.mxu0 %v5077_v42  ;;  %v5147_v41 = vld [vmem:[%s6926_s7 + $0x518] ss:$28 sps:$4 sm:$0xff]   ;;  %v5151_v42 = vld [vmem:[%s6926_s7 + $0x1a0] ss:$28 sps:$4 sm:$0xff]  }
 0x2ee   : > { %3737 = vmatprep.subr.bf16.mxu1 %v5080_v43  ;;  %v5154_v43 = vld [vmem:[%s6926_s7 + $0x4e4] ss:$28 sps:$4 sm:$0xff]  }
 0x2f0   : > { %3685 = vmatpush1.bf16.msra.mxu0 %v5075_v9  ;;  %v5155_v9 = vld [vmem:[%s6926_s7 + $0x328] ss:$28 sps:$4 sm:$0xff]  }
 0x2f1   : > { %3738 = vmatpush1.bf16.msra.mxu1 %v5078_v44  ;;  %3686 = vmatprep.subr.bf16.mxu0 %v5083_v47  ;;  %v5152_v44 = vld [vmem:[%s6926_s7 + $0x4e0] ss:$28 sps:$4 sm:$0xff]   ;;  %v5156_v47 = vld [vmem:[%s6926_s7 + $0x168] ss:$28 sps:$4 sm:$0xff]  }
 0x2f2   : > { %3739 = vmatprep.subr.bf16.mxu1 %v5086_v48  ;;  %v5159_v48 = vld [vmem:[%s6926_s7 + $0x4ac] ss:$28 sps:$4 sm:$0xff]  }
 0x2f4   : > { %3687 = vmatpush1.bf16.msra.mxu0 %v5081_v49  ;;  %v5160_v49 = vld [vmem:[%s6926_s7 + $0x2f0] ss:$28 sps:$4 sm:$0xff]  }
 0x2f5   : > { %3740 = vmatpush1.bf16.msra.mxu1 %v5084_v51  ;;  %3688 = vmatprep.subr.bf16.mxu0 %v5089_v52  ;;  %v5157_v51 = vld [vmem:[%s6926_s7 + $0x4a8] ss:$28 sps:$4 sm:$0xff]   ;;  %v5161_v52 = vld [vmem:[%s6926_s7 + $0x130] ss:$28 sps:$4 sm:$0xff]  }
 0x2f6   : > { %3741 = vmatprep.subr.bf16.mxu1 %v5092_v53  ;;  %v5164_v53 = vld [vmem:[%s6926_s7 + $0x474] ss:$28 sps:$4 sm:$0xff]  }
 0x2f8   : > { %3689 = vmatpush1.bf16.msra.mxu0 %v5087_v55  ;;  %v5165_v55 = vld [vmem:[%s6926_s7 + $0x2b8] ss:$28 sps:$4 sm:$0xff]  }
 0x2f9   : > { %3742 = vmatpush1.bf16.msra.mxu1 %v5090_v56  ;;  %3690 = vmatprep.subr.bf16.mxu0 %v5095_v57  ;;  %v5162_v56 = vld [vmem:[%s6926_s7 + $0x470] ss:$28 sps:$4 sm:$0xff]   ;;  %v5166_v57 = vld [vmem:[%s6926_s7 + $0xf8] ss:$28 sps:$4 sm:$0xff]  }
 0x2fa   : > { %3743 = vmatprep.subr.bf16.mxu1 %v5098_v58  ;;  %v5169_v58 = vld [vmem:[%s6926_s7 + $0x43c] ss:$28 sps:$4 sm:$0xff]  }
 0x2fc   : > { %3691 = vmatpush1.bf16.msra.mxu0 %v5093_v59  ;;  %v5170_v59 = vld [vmem:[%s6926_s7 + $0x280] ss:$28 sps:$4 sm:$0xff]  }
 0x2fd   : > { %3744 = vmatpush1.bf16.msra.mxu1 %v5096_v60  ;;  %3692 = vmatprep.subr.bf16.mxu0 %v5101_v61  ;;  %v5171_v60 = vld [vmem:[%s6926_s7 + $0xc0] ss:$28 sps:$4 sm:$0xff]  }
 0x2fe   : > { %3745 = vmatprep.subr.bf16.mxu1 %v5104_v62  ;;  %v5174_v61 = vld [vmem:[%s6926_s7 + $0x404] ss:$28 sps:$4 sm:$0xff]  }
 0x2ff   : > { %v5175_v62 = vld [vmem:[%s6926_s7 + $0x248] ss:$28 sps:$4 sm:$0xff]  }
 0x300   : > { %3693 = vmatpush2.bf16.msra.mxu0 %v5099_v1  ;;  %v5172_v1 = vld [vmem:[%s6926_s7 + $0x400] ss:$28 sps:$4 sm:$0xff]  }
 0x301   : > { %3746 = vmatpush2.bf16.msra.mxu1 %v5102_v2  ;;  %3694 = vmatprep.subr.bf16.mxu0 %v5107_v3  ;;  %v5176_v2 = vld [vmem:[%s6926_s7 + $0x88] ss:$28 sps:$4 sm:$0xff]  }
 0x302   : > { %3747 = vmatprep.subr.bf16.mxu1 %v5110_v4  ;;  %v5179_v3 = vld [vmem:[%s6926_s7 + $0x3cc] ss:$28 sps:$4 sm:$0xff]  }
 0x303   : > { %v5180_v4 = vld [vmem:[%s6926_s7 + $0x210] ss:$28 sps:$4 sm:$0xff]  }
 0x304   : > { %3695 = vmatpush2.bf16.msra.mxu0 %v5105_v11  ;;  %v5177_v11 = vld [vmem:[%s6926_s7 + $0x3c8] ss:$28 sps:$4 sm:$0xff]  }
 0x305   : > { %3748 = vmatpush2.bf16.msra.mxu1 %v5108_v12  ;;  %3696 = vmatprep.subr.bf16.mxu0 %v5113_v13  ;;  %v5181_v12 = vld [vmem:[%s6926_s7 + $0x50] ss:$28 sps:$4 sm:$0xff]  }
 0x306   : > { %3749 = vmatprep.subr.bf16.mxu1 %v5116_v15  ;;  %v5184_v13 = vld [vmem:[%s6926_s7 + $0x394] ss:$28 sps:$4 sm:$0xff]  }
 0x307   : > { %v5185_v15 = vld [vmem:[%s6926_s7 + $0x1d8] ss:$28 sps:$4 sm:$0xff]  }
 0x308   : > { %3697 = vmatpush2.bf16.msra.mxu0 %v5111_v16  ;;  %v5182_v16 = vld [vmem:[%s6926_s7 + $0x390] ss:$28 sps:$4 sm:$0xff]  }
 0x309   : > { %3750 = vmatpush2.bf16.msra.mxu1 %v5114_v46  ;;  %3698 = vmatprep.subr.bf16.mxu0 %v5119_v10  ;;  %v5186_v46 = vld [vmem:[%s6926_s7 + $0x18] ss:$28 sps:$4 sm:$0xff]  }
 0x30a   : > { %3751 = vmatprep.subr.bf16.mxu1 %v5122_v17  ;;  %v5189_v10 = vld [vmem:[%s6926_s7 + $0x6dc] ss:$28 sps:$4 sm:$0xff]  }
 0x30b   : > { %v6697_v17 = vld [vmem:[%s6926_s7 + $0x6e0] ss:$28 sps:$4 sm:$0xff]  }
 0x30c   : > { %3699 = vmatpush2.bf16.msra.mxu0 %v5117_v7  ;;  %v5187_v7 = vld [vmem:[%s6926_s7 + $0x6d8] ss:$28 sps:$4 sm:$0xff]  }
 0x30d   : > { %3752 = vmatpush2.bf16.msra.mxu1 %v5120_v8  ;;  %3700 = vmatprep.subr.bf16.mxu0 %v5125_v18  ;;  %v6705_v8 = vld [vmem:[%s6926_s7 + $0x520] ss:$28 sps:$4 sm:$0xff]  }
 0x30e   : > { %3753 = vmatprep.subr.bf16.mxu1 %v5128_v19  ;;  %v5194_v18 = vld [vmem:[%s6926_s7 + $0x6a4] ss:$28 sps:$4 sm:$0xff]  }
 0x30f   : > { %v6714_v19 = vld [vmem:[%s6926_s7 + $0x6a8] ss:$28 sps:$4 sm:$0xff]  }
 0x310   : > { %3701 = vmatpush2.bf16.msra.mxu0 %v5123_v20  ;;  %v5192_v20 = vld [vmem:[%s6926_s7 + $0x6a0] ss:$28 sps:$4 sm:$0xff]  }
 0x311   : > { %3754 = vmatpush2.bf16.msra.mxu1 %v5126_v21  ;;  %3702 = vmatprep.subr.bf16.mxu0 %v5131_v22  ;;  %v5196_v21 = vld [vmem:[%s6926_s7 + $0x4e8] ss:$28 sps:$4 sm:$0xff]  }
 0x312   : > { %3755 = vmatprep.subr.bf16.mxu1 %v5134_v23  ;;  %v5199_v22 = vld [vmem:[%s6926_s7 + $0x66c] ss:$28 sps:$4 sm:$0xff]  }
 0x313   : > { %v5201_v23 = vld [vmem:[%s6926_s7 + $0x4b0] ss:$28 sps:$4 sm:$0xff]  }
 0x314   : > { %3703 = vmatpush2.bf16.msra.mxu0 %v5129_v24  ;;  %v5204_v24 = vld [vmem:[%s6926_s7 + $0x634] ss:$28 sps:$4 sm:$0xff]  }
 0x315   : > { %3756 = vmatpush2.bf16.msra.mxu1 %v5132_v25  ;;  %3704 = vmatprep.subr.bf16.mxu0 %v5137_v29  ;;  %v5205_v25 = vld [vmem:[%s6926_s7 + $0x638] ss:$28 sps:$4 sm:$0xff]   ;;  %v5202_v29 = vld [vmem:[%s6926_s7 + $0x630] ss:$28 sps:$4 sm:$0xff]  }
 0x316   : > { %3757 = vmatprep.subr.bf16.mxu1 %v5140_v30  ;;  %v5206_v30 = vld [vmem:[%s6926_s7 + $0x478] ss:$28 sps:$4 sm:$0xff]  }
 0x318   : > { %3705 = vmatpush2.bf16.msra.mxu0 %v5135_v31  ;;  %v5209_v31 = vld [vmem:[%s6926_s7 + $0x5fc] ss:$28 sps:$4 sm:$0xff]  }
 0x319   : > { %3758 = vmatpush2.bf16.msra.mxu1 %v5138_v32  ;;  %3706 = vmatprep.subr.bf16.mxu0 %v5143_v33  ;;  %v5207_v32 = vld [vmem:[%s6926_s7 + $0x5f8] ss:$28 sps:$4 sm:$0xff]   ;;  %v5211_v33 = vld [vmem:[%s6926_s7 + $0x440] ss:$28 sps:$4 sm:$0xff]  }
 0x31a   : > { %3759 = vmatprep.subr.bf16.mxu1 %v5146_v35  ;;  %v5214_v35 = vld [vmem:[%s6926_s7 + $0x5c4] ss:$28 sps:$4 sm:$0xff]  }
 0x31c   : > { %3707 = vmatpush2.bf16.msra.mxu0 %v5141_v37  ;;  %v5215_v37 = vld [vmem:[%s6926_s7 + $0x5c8] ss:$28 sps:$4 sm:$0xff]  }
 0x31d   : > { %3760 = vmatpush2.bf16.msra.mxu1 %v5144_v38  ;;  %3782 = vmatprep.subr.bf16.mxu0 %v5149_v39  ;;  %v5212_v38 = vld [vmem:[%s6926_s7 + $0x5c0] ss:$28 sps:$4 sm:$0xff]   ;;  %v5216_v39 = vld [vmem:[%s6926_s7 + $0x408] ss:$28 sps:$4 sm:$0xff]  }
 0x31e   : > { %4483 = vmatprep.subr.bf16.mxu1 %v5150_v40  ;;  %v5219_v40 = vld [vmem:[%s6926_s7 + $0x58c] ss:$28 sps:$4 sm:$0xff]  }
 0x31f   : > { %3709 = vmatmul.mubr.bf16.vlgmr.msra.gmra.mxu0 %v6389_v45 }
 0x320   : > { %3718 = vmatprep.mubr.bf16.mxu0 %v6416_v34  ;;  %3762 = vmatmul.mubr.bf16.vlgmr.msra.gmra.mxu1 %v6276_v54 }
 0x321   : > { %3783 = vmatpush1.bf16.msra.mxu0 %v5147_v41  ;;  %3771 = vmatprep.mubr.bf16.mxu1 %v6291_v6  ;;  %v5220_v41 = vld [vmem:[%s6926_s7 + $0x590] ss:$28 sps:$4 sm:$0xff]  }
 0x322   : > { %4484 = vmatpush3.bf16.msra.mxu1 %v5151_v42  ;;  %3784 = vmatprep.subr.bf16.mxu0 %v5154_v43  ;;  %v5217_v42 = vld [vmem:[%s6926_s7 + $0x588] ss:$28 sps:$4 sm:$0xff]   ;;  %v5221_v43 = vld [vmem:[%s6926_s7 + $0x3d0] ss:$28 sps:$4 sm:$0xff]  }
 0x323   : > { %4485 = vmatprep.subr.bf16.mxu1 %v5155_v9  ;;  %v5224_v9 = vld [vmem:[%s6926_s7 + $0x554] ss:$28 sps:$4 sm:$0xff]  }
 0x325   : > { %3785 = vmatpush1.bf16.msra.mxu0 %v5152_v44  ;;  %v5225_v44 = vld [vmem:[%s6926_s7 + $0x558] ss:$28 sps:$4 sm:$0xff]  }
 0x326   : > { %4486 = vmatpush3.bf16.msra.mxu1 %v5156_v47  ;;  %3786 = vmatprep.subr.bf16.mxu0 %v5159_v48  ;;  %v5222_v47 = vld [vmem:[%s6926_s7 + $0x550] ss:$28 sps:$4 sm:$0xff]   ;;  %v5226_v48 = vld [vmem:[%s6926_s7 + $0x398] ss:$28 sps:$4 sm:$0xff]  }
 0x327   : > { %3719 = vmatmul.mubr.bf16.gmra.mxu0 %v6421_v36  ;;  %4487 = vmatprep.subr.bf16.mxu1 %v5160_v49 }
 0x328   : > { %3772 = vmatmul.mubr.bf16.gmra.mxu1 %v6289_v5  ;;  %3814 = vmatprep.mubr.bf16.mxu0 %v6384_v14 }
 0x329   : > { %3787 = vmatpush1.bf16.msra.mxu0 %v5157_v51  ;;  %3867 = vmatprep.mubr.bf16.mxu1 %v6271_v50  ;;  %v5167_v50 = vld [vmem:[%s6926_s7 + $0x438] ss:$28 sps:$4 sm:$0xff]  }
 0x32a   : > { %4488 = vmatpush3.bf16.msra.mxu1 %v5161_v52  ;;  %3788 = vmatprep.subr.bf16.mxu0 %v5164_v53 }
 0x32b   : > { %4489 = vmatprep.subr.bf16.mxu1 %v5165_v55 }
 0x32d   : > { %3789 = vmatpush1.bf16.msra.mxu0 %v5162_v56 }
 0x32e   : > { %4490 = vmatpush3.bf16.msra.mxu1 %v5166_v57  ;;  %3790 = vmatprep.subr.bf16.mxu0 %v5169_v58 }
 0x32f   : > { %4491 = vmatprep.subr.bf16.mxu1 %v5170_v59 }
 0x331   : > { %3791 = vmatpush1.bf16.msra.mxu0 %v5167_v50 }
 0x332   : > { %4492 = vmatpush3.bf16.msra.mxu1 %v5171_v60  ;;  %3792 = vmatprep.subr.bf16.mxu0 %v5174_v61 }
 0x333   : > { %4493 = vmatprep.subr.bf16.mxu1 %v5175_v62 }
 0x335   : > { %3793 = vmatpush1.bf16.msra.mxu0 %v5172_v1 }
 0x336   : > { %4494 = vmatpush3.bf16.msra.mxu1 %v5176_v2  ;;  %3794 = vmatprep.subr.bf16.mxu0 %v5179_v3 }
 0x337   : > { %4495 = vmatprep.subr.bf16.mxu1 %v5180_v4 }
 0x339   : > { %3795 = vmatpush1.bf16.msra.mxu0 %v5177_v11 }
 0x33a   : > { %4496 = vmatpush3.bf16.msra.mxu1 %v5181_v12  ;;  %3796 = vmatprep.subr.bf16.mxu0 %v5184_v13 }
 0x33b   : > { %4497 = vmatprep.subr.bf16.mxu1 %v5185_v15 }
 0x33d   : > { %3797 = vmatpush1.bf16.msra.mxu0 %v5182_v16 }
 0x33e   : > { %4498 = vmatpush3.bf16.msra.mxu1 %v5186_v46  ;;  %3798 = vmatprep.subr.bf16.mxu0 %v5189_v10 }
 0x33f   : > { %4539 = vmatprep.subr.bf16.mxu1 %v6697_v17 }
 0x341   : > { %3799 = vmatpush2.bf16.msra.mxu0 %v5187_v7  ;;  %3868 = vmatmul.mubr.bf16.vlgmr.msra.gmra.mxu1 %v6276_v54  ;;  %v5200_v54 = vld [vmem:[%s6926_s7 + $0x670] ss:$28 sps:$4 sm:$0xff]  }
 0x342   : > { %3875 = vmatprep.mubr.bf16.mxu1 %v6291_v6  ;;  %4547 = vmatpush3.bf16.msra.mxu1 %v6705_v8  ;;  %v5197_v6 = vld [vmem:[%s6926_s7 + $0x668] ss:$28 sps:$4 sm:$0xff]  }
 0x343   : > { %3800 = vmatprep.subr.bf16.mxu0 %v5194_v18  ;;  %4540 = vmatprep.subr.bf16.mxu1 %v6714_v19 }
 0x345   : > { %3801 = vmatpush2.bf16.msra.mxu0 %v5192_v20 }
 0x346   : > { %4548 = vmatpush3.bf16.msra.mxu1 %v5196_v21  ;;  %3802 = vmatprep.subr.bf16.mxu0 %v5199_v22 }
 0x347   : > { %4541 = vmatprep.subr.bf16.mxu1 %v5200_v54 }
 0x349   : > { %3803 = vmatpush2.bf16.msra.mxu0 %v5197_v6  ;;  %3876 = vmatmul.mubr.bf16.gmra.mxu1 %v6289_v5  ;;  %v5210_v5 = vld [vmem:[%s6926_s7 + $0x600] ss:$28 sps:$4 sm:$0xff]  }
 0x34a   : > { %4549 = vmatpush3.bf16.msra.mxu1 %v5201_v23  ;;  %3924 = vmatprep.mubr.bf16.mxu1 %v6416_v34 }
 0x34b   : > { %3804 = vmatprep.subr.bf16.mxu0 %v5204_v24  ;;  %4542 = vmatprep.subr.bf16.mxu1 %v5205_v25 }
 0x34d   : > { %3805 = vmatpush2.bf16.msra.mxu0 %v5202_v29 }
 0x34e   : > { %4550 = vmatpush3.bf16.msra.mxu1 %v5206_v30  ;;  %3806 = vmatprep.subr.bf16.mxu0 %v5209_v31 }
 0x34f   : > { %4543 = vmatprep.subr.bf16.mxu1 %v5210_v5 }
 0x351   : > { %3807 = vmatpush2.bf16.msra.mxu0 %v5207_v32 }
 0x352   : > { %4551 = vmatpush3.bf16.msra.mxu1 %v5211_v33  ;;  %3808 = vmatprep.subr.bf16.mxu0 %v5214_v35 }
 0x353   : > { %4544 = vmatprep.subr.bf16.mxu1 %v5215_v37 }
 0x355   : > { %3809 = vmatpush2.bf16.msra.mxu0 %v5212_v38 }
 0x356   : > { %4552 = vmatpush3.bf16.msra.mxu1 %v5216_v39  ;;  %3810 = vmatprep.subr.bf16.mxu0 %v5219_v40 }
 0x357   : > { %4545 = vmatprep.subr.bf16.mxu1 %v5220_v41 }
 0x359   : > { %3811 = vmatpush2.bf16.msra.mxu0 %v5217_v42 }
 0x35a   : > { %4553 = vmatpush3.bf16.msra.mxu1 %v5221_v43  ;;  %3812 = vmatprep.subr.bf16.mxu0 %v5224_v9 }
 0x35b   : > { %4546 = vmatprep.subr.bf16.mxu1 %v5225_v44 }
 0x35d   : > { %3813 = vmatpush2.bf16.msra.mxu0 %v5222_v47 }
 0x35e   : > { %4554 = vmatpush3.bf16.msra.mxu1 %v5226_v48  ;;  %4511 = vmatprep.subr.bf16.mxu0 %v6697_v17 }
 0x360   : > { %3815 = vmatmul.mubr.bf16.vlgmr.msra.gmra.mxu0 %v6389_v45 }
 0x361   : > { %3824 = vmatprep.mubr.bf16.mxu0 %v6416_v34  ;;  %4512 = vmatpush3.bf16.msra.mxu0 %v6705_v8  ;;  %v3551_v34 = vpop.f32.mrf.mxu1 }
 0x362   : > { %3925 = vmatmul.mubr.bf16.vlgmr.msra.gmra.mxu1 %v6421_v36  ;;  %4513 = vmatprep.subr.bf16.mxu0 %v6714_v19 }
 0x363   : > { %v3553_v49 = vpop.f32.mrf.mxu1 }
 0x365   : > { %4514 = vmatpush3.bf16.msra.mxu0 %v5196_v21 }
 0x366   : > { %4515 = vmatprep.subr.bf16.mxu0 %v5200_v54 }
 0x368   : > { %3825 = vmatmul.mubr.bf16.gmra.mxu0 %v6421_v36  ;;  %v3555_v36 = vpop.f32.mrf.mxu1 }
 0x369   : > { %4516 = vmatpush3.bf16.msra.mxu0 %v5201_v23  ;;  %3916 = vmatprep.mubr.bf16.mxu0 %v6384_v14  ;;  %v6812_v14 = vld [vmem:[%s6927_s8] sm:$0x7f] }
 0x36a   : > { %4517 = vmatprep.subr.bf16.mxu0 %v5205_v25  ;;  %v2333_v51 = vrot.slane %v6812_v14, %v5642_v28  ;;  %v3557_v52 = vpop.f32.mrf.mxu1  ;;  %v2337_v53 = vrot.slane %v6812_v14, %v5639_v27  ;;  %v2341_v23 = vrot.slane %v6812_v14, %v5845_v0  ;;  %v2345_v24 = vrot.slane %v6812_v14, %v5842_v63 }
 0x36c   : > { %v3561_v55 = vpop.f32.mrf.mxu1  ;;  %v3554_v57 = vadd.f32 %v3553_v49, %v2337_v53  ;;  %v3556_v60 = vadd.f32 %v3555_v36, %v2333_v51  ;;  %v3558_v62 = vadd.f32 %v3557_v52, %v2337_v53 }
 0x36d   : > { %4518 = vmatpush3.bf16.msra.mxu0 %v5206_v30  ;;  %v3562_v3 = vadd.f32 %v3561_v55, %v2333_v51 }
 0x36e   : > { %4519 = vmatprep.subr.bf16.mxu0 %v5210_v5  ;;  %v3563_v59 = vpop.f32.mrf.mxu1 }
 0x36f   : > { %v3564_v12 = vadd.f32 %v3563_v59, %v2337_v53 }
 0x370   : > { %v3565_v1 = vpop.f32.mrf.mxu1 }
 0x371   : > { %4520 = vmatpush3.bf16.msra.mxu0 %v5211_v33  ;;  %v3566_v46 = vadd.f32 %v3565_v1, %v2333_v51 }
 0x372   : > { %4521 = vmatprep.subr.bf16.mxu0 %v5215_v37  ;;  %v3567_v15 = vpop.f32.mrf.mxu1 }
 0x373   : > { %v3568_v7 = vadd.f32 %v3567_v15, %v2337_v53 }
 0x375   : > { %4522 = vmatpush3.bf16.msra.mxu0 %v5216_v39 }
 0x376   : > { %4523 = vmatprep.subr.bf16.mxu0 %v5220_v41 }
 0x379   : > { %4524 = vmatpush3.bf16.msra.mxu0 %v5221_v43 }
 0x37a   : > { %4525 = vmatprep.subr.bf16.mxu0 %v5225_v44 }
 0x37d   : > { %4526 = vmatpush3.bf16.msra.mxu0 %v5226_v48 }
 0x380   : > { %3917 = vmatmul.mubr.bf16.vlgmr.msra.gmra.mxu0 %v6389_v45  ;;  %v3552_v45 = vadd.f32 %v3551_v34, %v2333_v51 }
 0x39f   : > { %v3604_v56 = vpop.f32.mrf.mxu0  ;;  %v3657_v20 = vpop.f32.mrf.mxu1 }
 0x3a0   : > { %v3605_v58 = vadd.f32 %v3604_v56, %v3552_v45  ;;  %v3658_v29 = vadd.f32 %v3657_v20, %v2341_v23 }
 0x3a1   : > { %v3606_v50 = vpop.f32.mrf.mxu0  ;;  %v3659_v21 = vpop.f32.mrf.mxu1 }
 0x3a2   : > { %3933 = vst [vmem:[%s6821_s28] sm:$0xff] %v3605_v58  ;;  %v3607_v28 = vadd.f32 %v3606_v50, %v3554_v57  ;;  %v3660_v31 = vadd.f32 %v3659_v21, %v2345_v24 }
 0x3a3   : > { %v3608_v61 = vpop.f32.mrf.mxu0  ;;  %v3661_v22 = vpop.f32.mrf.mxu1 }
 0x3a4   : > { %3934 = vst [vmem:[%s6821_s28 + $0x8] sm:$0xff] %v3607_v28  ;;  %v3609_v27 = vadd.f32 %v3608_v61, %v3556_v60  ;;  %v3662_v35 = vadd.f32 %v3661_v22, %v2341_v23 }
 0x3a5   : > { %v3610_v2 = vpop.f32.mrf.mxu0  ;;  %v3663_v54 = vpop.f32.mrf.mxu1 }
 0x3a6   : > { %3941 = vst [vmem:[%s6821_s28 + $0x38] sm:$0xff] %v3609_v27  ;;  %v3611_v4 = vadd.f32 %v3610_v2, %v3558_v62  ;;  %v3664_v39 = vadd.f32 %v3663_v54, %v2345_v24  ;;  %v2348_v2 = vsub.s32 4, %v5636_v26 }
 0x3a7   : > { %v3614_v11 = vpop.f32.mrf.mxu0  ;;  %v3667_v6 = vpop.f32.mrf.mxu1 }
 0x3a8   : > { %3942 = vst [vmem:[%s6821_s28 + $0x40] sm:$0xff] %v3611_v4  ;;  %v3615_v13 = vadd.f32 %v3614_v11, %v3562_v3  ;;  %v3668_v63 = vadd.f32 %v3667_v6, %v2341_v23  ;;  %v2352_v4 = vsub.s32 5, %v5636_v26  ;;  %v2349_v11 = vrot.slane %v6812_v14, %v2348_v2 }
 0x3a9   : > { %v3616_v16 = vpop.f32.mrf.mxu0  ;;  %v3669_v25 = vpop.f32.mrf.mxu1 }
 0x3aa   : > { %3948 = vst [vmem:[%s6821_s28 + $0x70] sm:$0xff] %v3615_v13  ;;  %v3617_v10 = vadd.f32 %v3616_v16, %v3564_v12  ;;  %v3670_v44 = vadd.f32 %v3669_v25, %v2345_v24  ;;  %v2353_v13 = vrot.slane %v6812_v14, %v2352_v4  ;;  %v2356_v16 = vsub.s32 6, %v5636_v26 }
 0x3ab   : > { %v3618_v17 = vpop.f32.mrf.mxu0  ;;  %v3671_v5 = vpop.f32.mrf.mxu1 }
 0x3ac   : > { %3949 = vst [vmem:[%s6821_s28 + $0x78] sm:$0xff] %v3617_v10  ;;  %v3619_v8 = vadd.f32 %v3618_v17, %v3566_v46  ;;  %v3672_v34 = vadd.f32 %v3671_v5, %v2341_v23  ;;  %v2357_v21 = vrot.slane %v6812_v14, %v2356_v16 }
 0x3ad   : > { %v3620_v18 = vpop.f32.mrf.mxu0  ;;  %v3673_v40 = vpop.f32.mrf.mxu1 }
 0x3ae   : > { %3955 = vst [vmem:[%s6821_s28 + $0xa8] sm:$0xff] %v3619_v8  ;;  %v3621_v19 = vadd.f32 %v3620_v18, %v3568_v7  ;;  %v3674_v52 = vadd.f32 %v3673_v40, %v2345_v24 }
 0x3b0   : > { %3956 = vst [vmem:[%s6821_s28 + $0xb0] sm:$0xff] %v3621_v19 }
 0x3df   : > { %v3710_v30 = vpop.f32.mrf.mxu0 }
 0x3e0   : > { %v3711_v32 = vadd.f32 %v3710_v30, %v3658_v29  ;;  %v3763_v42 = vpop.f32.mrf.mxu1 }
 0x3e1   : > { %v3712_v33 = vpop.f32.mrf.mxu0  ;;  %v3764_v15 = vadd.f32 %v3763_v42, %v2349_v11 }
 0x3e2   : > { %3935 = vst [vmem:[%s6821_s28 + $0x10] sm:$0xff] %v3711_v32  ;;  %v3713_v37 = vadd.f32 %v3712_v33, %v3660_v31  ;;  %v3765_v49 = vpop.f32.mrf.mxu1 }
 0x3e3   : > { %v3714_v38 = vpop.f32.mrf.mxu0  ;;  %v3766_v17 = vadd.f32 %v3765_v49, %v2353_v13 }
 0x3e4   : > { %3936 = vst [vmem:[%s6821_s28 + $0x18] sm:$0xff] %v3713_v37  ;;  %v3715_v0 = vadd.f32 %v3714_v38, %v3662_v35  ;;  %v3767_v45 = vpop.f32.mrf.mxu1 }
 0x3e5   : > { %v3716_v41 = vpop.f32.mrf.mxu0  ;;  %v3768_v20 = vadd.f32 %v3767_v45, %v2349_v11 }
 0x3e6   : > { %3943 = vst [vmem:[%s6821_s28 + $0x48] sm:$0xff] %v3715_v0  ;;  %v3717_v43 = vadd.f32 %v3716_v41, %v3664_v39  ;;  %v3769_v57 = vpop.f32.mrf.mxu1 }
 0x3e7   : > { %v3720_v9 = vpop.f32.mrf.mxu0  ;;  %v3770_v54 = vadd.f32 %v3769_v57, %v2353_v13 }
 0x3e8   : > { %3944 = vst [vmem:[%s6821_s28 + $0x50] sm:$0xff] %v3717_v43  ;;  %v3721_v47 = vadd.f32 %v3720_v9, %v3668_v63  ;;  %v3773_v58 = vpop.f32.mrf.mxu1 }
 0x3e9   : > { %v3722_v48 = vpop.f32.mrf.mxu0  ;;  %v3774_v5 = vadd.f32 %v3773_v58, %v2349_v11 }
 0x3ea   : > { %3950 = vst [vmem:[%s6821_s28 + $0x80] sm:$0xff] %v3721_v47  ;;  %v3723_v36 = vadd.f32 %v3722_v48, %v3670_v44  ;;  %v3775_v59 = vpop.f32.mrf.mxu1 }
 0x3eb   : > { %v3724_v51 = vpop.f32.mrf.mxu0  ;;  %v3776_v37 = vadd.f32 %v3775_v59, %v2353_v13 }
 0x3ec   : > { %3951 = vst [vmem:[%s6821_s28 + $0x88] sm:$0xff] %v3723_v36  ;;  %v3725_v53 = vadd.f32 %v3724_v51, %v3672_v34  ;;  %v3777_v50 = vpop.f32.mrf.mxu1 }
 0x3ed   : > { %v3726_v55 = vpop.f32.mrf.mxu0  ;;  %v3778_v41 = vadd.f32 %v3777_v50, %v2349_v11 }
 0x3ee   : > { %3957 = vst [vmem:[%s6821_s28 + $0xb8] sm:$0xff] %v3725_v53  ;;  %v3727_v56 = vadd.f32 %v3726_v55, %v3674_v52  ;;  %v3779_v60 = vpop.f32.mrf.mxu1 }
 0x3ef   : > { %v3780_v9 = vadd.f32 %v3779_v60, %v2353_v13 }
 0x3f0   : > { %3958 = vst [vmem:[%s6821_s28 + $0xc0] sm:$0xff] %v3727_v56 }
 0x401   : > { %v4499_v28 = vpop.f32.mrf.mxu1 }
 0x403   : > { %v4500_v61 = vpop.f32.mrf.mxu1 }
 0x404   : > { %v4501_v34 = vadd.f32 %v4500_v61, %v4499_v28 }
 0x405   : > { %v6843_v62 = vpop.f32.mrf.mxu1 }
 0x406   : > { %v3870_v51 = vadd.f32 %v4501_v34, %v2357_v21 }
 0x407   : > { %v4503_v27 = vpop.f32.mrf.mxu1 }
 0x408   : > { %v4504_v52 = vadd.f32 %v4503_v27, %v6843_v62 }
 0x409   : > { %v4505_v1 = vpop.f32.mrf.mxu1 }
 0x40a   : > { %v3873_v57 = vadd.f32 %v4504_v52, %v2357_v21 }
 0x40b   : > { %v4506_v3 = vpop.f32.mrf.mxu1 }
 0x40c   : > { %v4507_v7 = vadd.f32 %v4506_v3, %v4505_v1 }
 0x40d   : > { %v4508_v12 = vpop.f32.mrf.mxu1 }
 0x40e   : > { %v3878_v24 = vadd.f32 %v4507_v7, %v2357_v21 }
 0x40f   : > { %v4509_v46 = vpop.f32.mrf.mxu1 }
 0x410   : > { %v4510_v26 = vadd.f32 %v4509_v46, %v4508_v12 }
 0x412   : > { %v3881_v38 = vadd.f32 %v4510_v26, %v2357_v21 }
 0x420   : > { %v3816_v10 = vpop.f32.mrf.mxu0 }
 0x421   : > { %v3817_v8 = vadd.f32 %v3816_v10, %v3764_v15 }
 0x422   : > { %v4533_v18 = vpop.f32.mrf.mxu1  ;;  %v3818_v19 = vpop.f32.mrf.mxu0 }
 0x423   : > { %3937 = vst [vmem:[%s6821_s28 + $0x20] sm:$0xff] %v3817_v8  ;;  %v3819_v22 = vadd.f32 %v3818_v19, %v3766_v17 }
 0x424   : > { %v4534_v6 = vpop.f32.mrf.mxu1  ;;  %v3820_v23 = vpop.f32.mrf.mxu0 }
 0x425   : > { %3938 = vst [vmem:[%s6821_s28 + $0x28] sm:$0xff] %v3819_v22  ;;  %v4535_v25 = vadd.f32 %v4534_v6, %v4533_v18  ;;  %v3821_v29 = vadd.f32 %v3820_v23, %v3768_v20 }
 0x426   : > { %v4536_v30 = vpop.f32.mrf.mxu1  ;;  %v3822_v31 = vpop.f32.mrf.mxu0 }
 0x427   : > { %v3927_v32 = vadd.f32 %v4535_v25, %v3878_v24  ;;  %3945 = vst [vmem:[%s6821_s28 + $0x58] sm:$0xff] %v3821_v29  ;;  %v3823_v14 = vadd.f32 %v3822_v31, %v3770_v54 }
 0x428   : > { %v4537_v33 = vpop.f32.mrf.mxu1  ;;  %v3826_v35 = vpop.f32.mrf.mxu0 }
 0x429   : > { %3954 = vst.msk [vmem:[%s6821_s28 + $0xa0] sm:$0xff] %vm3939_vm2, %v3927_v32  ;;  %3946 = vst [vmem:[%s6821_s28 + $0x60] sm:$0xff] %v3823_v14  ;;  %v4538_v39 = vadd.f32 %v4537_v33, %v4536_v30  ;;  %v3827_v40 = vadd.f32 %v3826_v35, %v3774_v5 }
 0x42a   : > { %v3828_v0 = vpop.f32.mrf.mxu0 }
 0x42b   : > { %v3930_v63 = vadd.f32 %v4538_v39, %v3881_v38  ;;  %3952 = vst [vmem:[%s6821_s28 + $0x90] sm:$0xff] %v3827_v40  ;;  %v3829_v42 = vadd.f32 %v3828_v0, %v3776_v37 }
 0x42c   : > { %v3830_v43 = vpop.f32.mrf.mxu0 }
 0x42d   : > { %3961 = vst.msk [vmem:[%s6821_s28 + $0xd8] sm:$0xff] %vm3939_vm2, %v3930_v63  ;;  %3953 = vst [vmem:[%s6821_s28 + $0x98] sm:$0xff] %v3829_v42  ;;  %v3831_v44 = vadd.f32 %v3830_v43, %v3778_v41 }
 0x42e   : > { %v3832_v47 = vpop.f32.mrf.mxu0 }
 0x42f   : > { %3959 = vst [vmem:[%s6821_s28 + $0xc8] sm:$0xff] %v3831_v44  ;;  %v3833_v48 = vadd.f32 %v3832_v47, %v3780_v9 }
 0x431   : > { %3960 = vst [vmem:[%s6821_s28 + $0xd0] sm:$0xff] %v3833_v48 }
 0x440   : > { %v4527_v49 = vpop.f32.mrf.mxu0 }
 0x442   : > { %v4528_v36 = vpop.f32.mrf.mxu0 }
 0x443   : > { %v4529_v53 = vadd.f32 %v4528_v36, %v4527_v49 }
 0x444   : > { %v4530_v55 = vpop.f32.mrf.mxu0 }
 0x445   : > { %v3919_v45 = vadd.f32 %v4529_v53, %v3870_v51 }
 0x446   : > { %v4531_v56 = vpop.f32.mrf.mxu0 }
 0x447   : > { %3940 = vst.msk [vmem:[%s6821_s28 + $0x30] sm:$0xff] %vm3939_vm2, %v3919_v45  ;;  %v4532_v58 = vadd.f32 %v4531_v56, %v4530_v55 }
 0x449   : > { %v3922_v59 = vadd.f32 %v4532_v58, %v3873_v57 }
 0x44b   : > { %3947 = vst.msk [vmem:[%s6821_s28 + $0x68] sm:$0xff] %vm3939_vm2, %v3922_v59 }
 0x44c   : > { %5240 = shalt.err (!%p5237_p3)
}
 0x44d   : > { %s5241_s25 = scalar_lea.hbm %s6871_s18, 3584  ;;  %s5245_s28 = scalar_lea.hbm %s6928_s9, 7168 }
 0x44e   : > { %p5242_p4 = scmp.ne.s32.totalorder %s6871_s18, %s5241_s25  ;;  %p5246_p9 = scmp.lt.s32.totalorder %s6871_s18, %s6928_s9 }
 0x44f   : > { %p5247_p10 = scmp.lt.s32.totalorder %s5245_s28, %s5241_s25 }
 0x450   : > { %p5243_p7 = pnand %p5242_p4, %p5381_p5 }
 0x451   : > { %p5248_p11 = por %p5247_p10, %p5246_p9 }
 0x452   : > { %p5244_p8 = pneg %p5243_p7 }
 0x454   : > { %p5249_p12 = pnand %p5248_p11, %p5244_p8 }
 0x456   : > { %5252 = shalt.err (!%p5249_p12)
}
 0x457   : > { %s5291_s17 = smov 896   ;;  %s5292_s21 = smov 56  }
 0x458   : > { %4557 = dma.vmem_to_hbm [thread:$0]  (%p5381_p5), %s6873_s16, 3584, %s6871_s18, %s6879_s13, %s5291_s17, %s5291_s17, %s5292_s21  }
 0x459 PF: > { %p4563_p13 = scmp.ge.s32.totalorder %s5287_s12, 2  ;;  %s3992_s22 = sand.u32 1, %s5275_s30  }
 0x45a   : > { %s3993_s24 = scalar_lea.sflag [#allocation3], %s3992_s22 }
 0x45b   : > { %p4560_p0 = pnand %p4563_p13, %p5385_p6 }
 0x45d   : > { %p4561_p1 = pneg %p4560_p0 }
 0x45f   : > { %5270 = dma.done.wait (%p4561_p1), %s3993_s24, 3584  }
 0x460   : > { %5272 = vsyncadd (%p4561_p1), %s3993_s24, 4294963712  ;;  %s6932_s29 = sld [smem:[#allocation5_spill]]  ;;  %p19_p2 = scmp.ge.s32.totalorder %s5368_s15, 4  }
 0x461   : > { %s6933_s30 = smov %s5279_s10  ;;  %s6934_s10 = smov %s5283_s11 }
 0x462   : > { %s6936_s12 = smov %s5368_s15  ;;  %21 = sbr.rel (!%p19_p2) target bundleno = 3 (0x3), region = 91 }
 0x466   : > { %s6935_s11 = smov %s6932_s29 }
 0x467   :  { %3998 = vsyncpa [#allocation3], 1 }
 0x468   :  { %4000 = vsyncpa [#allocation3 + $0x1], 1 }

</bundles_post_ra>
